<compile_context>
chip_gen: v5e
topology: v5e:2x2
jax: 0.10.0
libtpu: 0.0.40
codegen_flags: <defaults>
</compile_context>

<pallas_src>
import functools

import jax
import jax.numpy as jnp
from jax.experimental import pallas as pl
from jax.experimental.pallas import tpu as pltpu

LN_EPS = 1e-5  # PyTorch nn.LayerNorm default eps


def _layernorm(x, w, b):
    mean = jnp.mean(x, axis=-1, keepdims=True)
    var = jnp.mean(jnp.square(x - mean), axis=-1, keepdims=True)
    return (x - mean) * jax.lax.rsqrt(var + LN_EPS) * w + b


def slot_attention_kernel(
    x_ref, noise_ref, vec_ref, mat_ref, out_ref,
    *, num_iterations, eps, block_b, n, s, d, hidden):
    f32 = jnp.float32

    # ---- small packed vectors: read once (14 rows, fits in a few vregs) ----
    vec = vec_ref[...]
    mu      = vec[0:1, :d]
    sigma   = vec[1:2, :d]
    ln_in_w = vec[2:3, :d]
    ln_in_b = vec[3:4, :d]
    bq      = vec[4:5, :d]          # 1/sqrt(d) already folded in
    bk      = vec[5:6, :d]
    bv      = vec[6:7, :d]
    ln_s_w  = vec[7:8, :d]
    ln_s_b  = vec[8:9, :d]
    b_gru   = vec[9:10, :4 * d]     # [r | z | n_input | n_hidden] biases fused
    ln_ff_w = vec[10:11, :d]
    ln_ff_b = vec[11:12, :d]
    b1      = vec[12:13, :hidden]
    b2      = vec[13:14, :d]

    # fold the batch block into the matmul M dimension
    x = x_ref[...].reshape(block_b * n, d)            # (Bb*N, D)
    noise = noise_ref[...].reshape(block_b * s, d)    # (Bb*S, D)

    # slots ~ Normal(mu, sigma)  (reparameterized with externally drawn noise)
    slots = mu + sigma * noise                        # (Bb*S, D)

    # norm_input + k/v projections (loop-invariant, hoisted).  Weights are
    # read from the packed matrix slab at their point of use.
    xn = _layernorm(x, ln_in_w, ln_in_b)
    k = jnp.dot(xn, mat_ref[d:2 * d, :d], preferred_element_type=f32) + bk
    v = jnp.dot(xn, mat_ref[2 * d:3 * d, :d], preferred_element_type=f32) + bv
    k3 = k.reshape(block_b, n, d)
    v3 = v.reshape(block_b, n, d)

    for _ in range(num_iterations):
        slots_prev = slots

        sn = _layernorm(slots, ln_s_w, ln_s_b)
        q = jnp.dot(sn, mat_ref[0:d, :d], preferred_element_type=f32) + bq
        q3 = q.reshape(block_b, s, d)

        # dots[b, i, j] = <q_i, k_j>   (scale folded into wq/bq)
        dots = jnp.einsum("bid,bjd->bij", q3, k3,
                          preferred_element_type=f32)          # (Bb, S, N)
        # softmax over the SLOT axis (PyTorch dim=1)
        dmax = jnp.max(dots, axis=1, keepdims=True)
        ex = jnp.exp(dots - dmax)
        attn = ex * pl.reciprocal(jnp.sum(ex, axis=1, keepdims=True),
                                  approx=True) + eps
        # re-normalize over the input axis
        attn = attn * pl.reciprocal(jnp.sum(attn, axis=2, keepdims=True),
                                    approx=True)
        updates = jnp.einsum("bij,bjd->bid", attn, v3,
                             preferred_element_type=f32)       # (Bb, S, D)
        updates = updates.reshape(block_b * s, d)

        # fused GRUCell gates via TWO accumulated matmuls into one lane-dense
        # (M, 4D) result: [r | z | n_input | n_hidden] pre-activations.
        g = (jnp.dot(updates, mat_ref[3 * d:4 * d, :4 * d],
                     preferred_element_type=f32)
             + jnp.dot(slots_prev, mat_ref[4 * d:5 * d, :4 * d],
                       preferred_element_type=f32)
             + b_gru)
        r = jax.nn.sigmoid(g[:, 0:d])
        z = jax.nn.sigmoid(g[:, d:2 * d])
        n_gate = jnp.tanh(g[:, 2 * d:3 * d] + r * g[:, 3 * d:4 * d])
        slots = (1.0 - z) * n_gate + z * slots_prev

        # residual MLP: slots + fc2(relu(fc1(LN(slots))))
        sff = _layernorm(slots, ln_ff_w, ln_ff_b)
        h1 = jnp.maximum(
            jnp.dot(sff, mat_ref[5 * d:6 * d, :hidden],
                    preferred_element_type=f32) + b1, 0.0)
        slots = slots + jnp.dot(h1, mat_ref[6 * d:6 * d + hidden, :d],
                                preferred_element_type=f32) + b2

    # single consolidated store of the whole batch block
    out_ref[...] = slots.reshape(block_b, s, d)


def _device_kind():
    try:
        return (jax.devices()[0].device_kind or "").lower()
    except Exception:
        return ""


def _pick_block_b(b, n):
    """Generation-aware batch-block sizing.

    * v5e/v6e (1 TC): largest divisor of b, sized so block_b*n reaches the MXU
      row count (128 on v5e, 256 otherwise), capped at 64 rows of batch.
    * v7x (2 TCs): additionally keep >= 2 grid steps so the 'parallel' batch
      axis can shard across TensorCores.
    """
    kind = _device_kind()
    num_cores = 2 if "v7" in kind else 1
    target_rows = 128 if "v5" in kind else 256
    desired = max(1, -(-target_rows // max(n, 1)))   # ceil(target_rows / n)
    desired = min(desired, 64, b)
    if num_cores >= 2 and b >= num_cores:
        desired = min(desired, max(1, b // num_cores))
    bb = max(desired, 1)
    while b % bb:
        bb -= 1
    return max(bb, 1)


def slot_attention_forward(x, noise, params, *, num_iterations, eps=1e-8):
    (mu, sigma, ln_in_w, ln_in_b, wq, bq, wk, bk, wv, bv,
     ln_s_w, ln_s_b, w_ih, w_hh, b_ih, b_hh, ln_ff_w, ln_ff_b,
     w1, b1, w2, b2) = params
    b, n, d = x.shape
    s = noise.shape[1]
    hidden = w1.shape[0]
    scale = d ** -0.5
    f32 = jnp.float32

    # ---- host-side parameter packing (free layout plumbing) ----
    pad_w = max(d, 4 * d, hidden)

    def padrow(v):
        v = v.reshape(1, -1).astype(f32)
        return jnp.pad(v, ((0, 0), (0, pad_w - v.shape[1])))

    def padcols(m):
        m = m.astype(f32)
        return jnp.pad(m, ((0, 0), (0, pad_w - m.shape[1])))

    # fused GRU gate bias: [r | z | n_input | n_hidden]
    b_gru = jnp.concatenate(
        [(b_ih[0] + b_hh[0]).reshape(1, -1), (b_ih[1] + b_hh[1]).reshape(1, -1),
         b_ih[2].reshape(1, -1), b_hh[2].reshape(1, -1)], axis=1)

    # packed vector slab (14 rows)
    vec_buf = jnp.concatenate([
        padrow(mu), padrow(sigma),
        padrow(ln_in_w), padrow(ln_in_b),
        padrow(bq * scale),                 # fold attention scale into to_q bias
        padrow(bk), padrow(bv),
        padrow(ln_s_w), padrow(ln_s_b),
        padrow(b_gru),
        padrow(ln_ff_w), padrow(ln_ff_b),
        padrow(b1), padrow(b2),
    ], axis=0)

    zero_dd = jnp.zeros((d, d), f32)
    # split fused GRU weight at row D -> two (D, 4D) accumulated matmuls
    w_gru_u = jnp.concatenate([w_ih[0].T, w_ih[1].T, w_ih[2].T, zero_dd], axis=1)
    w_gru_h = jnp.concatenate([w_hh[0].T, w_hh[1].T, zero_dd, w_hh[2].T], axis=1)

    # packed matrix slab; row offsets: wq[0:d], wk[d:2d], wv[2d:3d],
    # gru_u[3d:4d], gru_h[4d:5d], w1[5d:6d], w2[6d:6d+hidden]
    mat_buf = jnp.concatenate([
        padcols(wq.T * scale),
        padcols(wk.T),
        padcols(wv.T),
        padcols(w_gru_u),
        padcols(w_gru_h),
        padcols(w1.T),
        padcols(w2.T),
    ], axis=0)

    block_b = _pick_block_b(b, n)
    grid = (b // block_b,)

    in_specs = [
        pl.BlockSpec((block_b, n, d), lambda i: (i, 0, 0)),
        pl.BlockSpec((block_b, s, d), lambda i: (i, 0, 0)),
        # full-shape parameter slabs with constant index_map: stay resident in
        # VMEM across grid steps (not re-fetched per step).
        pl.BlockSpec(vec_buf.shape, lambda i: (0, 0)),
        pl.BlockSpec(mat_buf.shape, lambda i: (0, 0)),
    ]
    out_spec = pl.BlockSpec((block_b, s, d), lambda i: (i, 0, 0))

    # advisory cost estimate so XLA schedules the custom call sensibly
    matmul_flops = b * (
        4 * n * d * d
        + num_iterations * (2 * s * d * d + 4 * s * n * d
                            + 4 * s * d * (4 * d)
                            + 4 * s * d * hidden))
    transcendentals = b * num_iterations * (s * n + 3 * s * d)
    bytes_accessed = 4 * (x.size + noise.size + b * s * d
                          + vec_buf.size + mat_buf.size)
    cost = pl.CostEstimate(flops=int(matmul_flops),
                           transcendentals=int(transcendentals),
                           bytes_accessed=int(bytes_accessed))

    kernel = functools.partial(
        slot_attention_kernel, num_iterations=num_iterations, eps=eps,
        block_b=block_b, n=n, s=s, d=d, hidden=hidden)

    out = pl.pallas_call(
        kernel,
        out_shape=jax.ShapeDtypeStruct((b, s, d), jnp.float32),
        grid=grid,
        in_specs=in_specs,
        out_specs=out_spec,
        compiler_params=pltpu.CompilerParams(
            dimension_semantics=("parallel",)),
        cost_estimate=cost,
    )(x, noise, vec_buf, mat_buf)
    return out


def slot_attention_ref(x, noise, params, *, num_iterations, eps=1e-8):
    """Pure-JAX reference mirroring the PyTorch forward."""
    (mu, sigma, ln_in_w, ln_in_b, wq, bq, wk, bk, wv, bv,
     ln_s_w, ln_s_b, w_ih, w_hh, b_ih, b_hh, ln_ff_w, ln_ff_b,
     w1, b1, w2, b2) = params
    b, n, d = x.shape
    scale = d ** -0.5

    slots = mu[None] + sigma[None] * noise                 # (B, S, D)
    xn = _layernorm(x, ln_in_w, ln_in_b)
    k = jnp.einsum("bnd,ed->bne", xn, wk) + bk
    v = jnp.einsum("bnd,ed->bne", xn, wv) + bv

    for _ in range(num_iterations):
        slots_prev = slots
        sn = _layernorm(slots, ln_s_w, ln_s_b)
        q = jnp.einsum("bsd,ed->bse", sn, wq) + bq
        dots = jnp.einsum("bid,bjd->bij", q, k) * scale
        attn = jax.nn.softmax(dots, axis=1) + eps
        attn = attn / jnp.sum(attn, axis=-1, keepdims=True)
        updates = jnp.einsum("bjd,bij->bid", v, attn)

        r = jax.nn.sigmoid(updates @ w_ih[0].T + b_ih[0] + slots_prev @ w_hh[0].T + b_hh[0])
        z = jax.nn.sigmoid(updates @ w_ih[1].T + b_ih[1] + slots_prev @ w_hh[1].T + b_hh[1])
        n_gate = jnp.tanh(updates @ w_ih[2].T + b_ih[2]
                          + r * (slots_prev @ w_hh[2].T + b_hh[2]))
        slots = (1.0 - z) * n_gate + z * slots_prev

        sff = _layernorm(slots, ln_ff_w, ln_ff_b)
        h1 = jnp.maximum(sff @ w1.T + b1, 0.0)
        slots = slots + h1 @ w2.T + b2
    return slots


if __name__ == "__main__":
    B, N, D = 2, 16, 32
    NUM_SLOTS = 4
    NUM_ITERATIONS = 3
    HIDDEN = max(D, 128)

    key = jax.random.PRNGKey(0)
    ks = jax.random.split(key, 20)

    def w_init(k, shape, s=0.1):
        return (jax.random.normal(k, shape, jnp.float32) * s).astype(jnp.float32)

    x = jax.random.normal(ks[0], (B, N, D), jnp.float32)
    # TODO(synk): torch.normal(mu, sigma) samples fresh noise per forward; here the
    # N(0,1) noise is generated once outside the kernel for determinism.
    noise = jax.random.normal(ks[1], (B, NUM_SLOTS, D), jnp.float32)

    params = (
        w_init(ks[2], (1, D), 1.0),                 # slots_mu
        jnp.abs(w_init(ks[3], (1, D), 1.0)),        # slots_sigma (nonneg std)
        jnp.ones((1, D), jnp.float32),              # norm_input.weight
        jnp.zeros((1, D), jnp.float32),             # norm_input.bias
        w_init(ks[4], (D, D)),  w_init(ks[5], (1, D)),          # to_q
        w_init(ks[6], (D, D)),  w_init(ks[7], (1, D)),          # to_k
        w_init(ks[8], (D, D)),  w_init(ks[9], (1, D)),          # to_v
        jnp.ones((1, D), jnp.float32),              # norm_slots.weight
        jnp.zeros((1, D), jnp.float32),             # norm_slots.bias
        w_init(ks[10], (3, D, D)),                  # gru.weight_ih  [r, z, n]
        w_init(ks[11], (3, D, D)),                  # gru.weight_hh  [r, z, n]
        w_init(ks[12], (3, 1, D)),                  # gru.bias_ih
        w_init(ks[13], (3, 1, D)),                  # gru.bias_hh
        jnp.ones((1, D), jnp.float32),              # norm_pre_ff.weight
        jnp.zeros((1, D), jnp.float32),             # norm_pre_ff.bias
        w_init(ks[14], (HIDDEN, D)), w_init(ks[15], (1, HIDDEN)),  # fc1
        w_init(ks[16], (D, HIDDEN)), w_init(ks[17], (1, D)),       # fc2
    )

    out = slot_attention_forward(x, noise, params, num_iterations=NUM_ITERATIONS)
    out = jax.block_until_ready(out)

    ref = jax.block_until_ready(
        slot_attention_ref(x, noise, params, num_iterations=NUM_ITERATIONS))

    assert out.shape == (B, NUM_SLOTS, D), out.shape
    assert jnp.allclose(out, ref, atol=5e-2, rtol=5e-2), float(jnp.max(jnp.abs(out - ref)))

    print("KERNEL_OK")
</pallas_src>

<mosaic_0001>
module attributes {stable_mosaic.version = 11 : i64} {
  func.func @slot_attention_kernel(%arg0: i32, %arg1: memref<2x16x32xf32, #tpu.memory_space<vmem>>, %arg2: memref<2x4x32xf32, #tpu.memory_space<vmem>>, %arg3: memref<14x128xf32, #tpu.memory_space<vmem>>, %arg4: memref<320x128xf32, #tpu.memory_space<vmem>>, %arg5: memref<2x4x32xf32, #tpu.memory_space<vmem>>) attributes {dimension_semantics = [#tpu.dimension_semantics<parallel>], iteration_bounds = array<i64: 1>, scalar_prefetch = 0 : i64, scratch_operands = 0 : i64, tpu.core_type = #tpu.core_type<tc>, window_params = [{transform_indices = @transform_0, window_bounds = array<i64: 2, 16, 32>}, {transform_indices = @transform_1, window_bounds = array<i64: 2, 4, 32>}, {pipeline_mode = #tpu.pipeline_mode<synchronous>, transform_indices = @transform_2, window_bounds = array<i64: 14, 128>}, {pipeline_mode = #tpu.pipeline_mode<synchronous>, transform_indices = @transform_3, window_bounds = array<i64: 320, 128>}, {transform_indices = @transform_4, window_bounds = array<i64: 2, 4, 32>}]} {
    %c0 = arith.constant 0 : index
    %c0_0 = arith.constant 0 : index
    %0 = vector.load %arg3[%c0, %c0_0] : memref<14x128xf32, #tpu.memory_space<vmem>>, vector<14x128xf32>
    %1 = vector.extract_strided_slice %0 {offsets = [0, 0], sizes = [1, 32], strides = [1, 1]} : vector<14x128xf32> to vector<1x32xf32>
    %2 = vector.extract_strided_slice %0 {offsets = [1, 0], sizes = [1, 32], strides = [1, 1]} : vector<14x128xf32> to vector<1x32xf32>
    %3 = vector.extract_strided_slice %0 {offsets = [2, 0], sizes = [1, 32], strides = [1, 1]} : vector<14x128xf32> to vector<1x32xf32>
    %4 = vector.extract_strided_slice %0 {offsets = [3, 0], sizes = [1, 32], strides = [1, 1]} : vector<14x128xf32> to vector<1x32xf32>
    %5 = vector.extract_strided_slice %0 {offsets = [4, 0], sizes = [1, 32], strides = [1, 1]} : vector<14x128xf32> to vector<1x32xf32>
    %6 = vector.extract_strided_slice %0 {offsets = [5, 0], sizes = [1, 32], strides = [1, 1]} : vector<14x128xf32> to vector<1x32xf32>
    %7 = vector.extract_strided_slice %0 {offsets = [6, 0], sizes = [1, 32], strides = [1, 1]} : vector<14x128xf32> to vector<1x32xf32>
    %8 = vector.extract_strided_slice %0 {offsets = [7, 0], sizes = [1, 32], strides = [1, 1]} : vector<14x128xf32> to vector<1x32xf32>
    %9 = vector.extract_strided_slice %0 {offsets = [8, 0], sizes = [1, 32], strides = [1, 1]} : vector<14x128xf32> to vector<1x32xf32>
    %10 = vector.extract_strided_slice %0 {offsets = [9, 0], sizes = [1, 128], strides = [1, 1]} : vector<14x128xf32> to vector<1x128xf32>
    %11 = vector.extract_strided_slice %0 {offsets = [10, 0], sizes = [1, 32], strides = [1, 1]} : vector<14x128xf32> to vector<1x32xf32>
    %12 = vector.extract_strided_slice %0 {offsets = [11, 0], sizes = [1, 32], strides = [1, 1]} : vector<14x128xf32> to vector<1x32xf32>
    %13 = vector.extract_strided_slice %0 {offsets = [12, 0], sizes = [1, 128], strides = [1, 1]} : vector<14x128xf32> to vector<1x128xf32>
    %14 = vector.extract_strided_slice %0 {offsets = [13, 0], sizes = [1, 32], strides = [1, 1]} : vector<14x128xf32> to vector<1x32xf32>
    %c0_1 = arith.constant 0 : index
    %c0_2 = arith.constant 0 : index
    %c0_3 = arith.constant 0 : index
    %15 = vector.load %arg1[%c0_1, %c0_2, %c0_3] : memref<2x16x32xf32, #tpu.memory_space<vmem>>, vector<2x16x32xf32>
    %16 = vector.shape_cast %15 : vector<2x16x32xf32> to vector<32x32xf32>
    %c0_4 = arith.constant 0 : index
    %c0_5 = arith.constant 0 : index
    %c0_6 = arith.constant 0 : index
    %17 = vector.load %arg2[%c0_4, %c0_5, %c0_6] : memref<2x4x32xf32, #tpu.memory_space<vmem>>, vector<2x4x32xf32>
    %18 = vector.shape_cast %17 : vector<2x4x32xf32> to vector<8x32xf32>
    %19 = vector.broadcast %2 : vector<1x32xf32> to vector<8x32xf32>
    %20 = arith.mulf %19, %18 : vector<8x32xf32>
    %21 = vector.broadcast %1 : vector<1x32xf32> to vector<8x32xf32>
    %22 = arith.addf %21, %20 : vector<8x32xf32>
    %cst = arith.constant dense<0.000000e+00> : vector<32xf32>
    %23 = vector.multi_reduction <add>, %16, %cst [1] : vector<32x32xf32> to vector<32xf32>
    %24 = vector.shape_cast %23 : vector<32xf32> to vector<32x1xf32>
    %cst_7 = arith.constant 3.200000e+01 : f32
    %25 = vector.broadcast %cst_7 : f32 to vector<32x1xf32>
    %26 = arith.divf %24, %25 : vector<32x1xf32>
    %27 = vector.broadcast %26 : vector<32x1xf32> to vector<32x32xf32>
    %28 = arith.subf %16, %27 : vector<32x32xf32>
    %29 = arith.mulf %28, %28 : vector<32x32xf32>
    %cst_8 = arith.constant dense<0.000000e+00> : vector<32xf32>
    %30 = vector.multi_reduction <add>, %29, %cst_8 [1] : vector<32x32xf32> to vector<32xf32>
    %31 = vector.shape_cast %30 : vector<32xf32> to vector<32x1xf32>
    %cst_9 = arith.constant 3.200000e+01 : f32
    %32 = vector.broadcast %cst_9 : f32 to vector<32x1xf32>
    %33 = arith.divf %31, %32 : vector<32x1xf32>
    %34 = vector.broadcast %26 : vector<32x1xf32> to vector<32x32xf32>
    %35 = arith.subf %16, %34 : vector<32x32xf32>
    %cst_10 = arith.constant 9.99999974E-6 : f32
    %36 = vector.broadcast %cst_10 : f32 to vector<32x1xf32>
    %37 = arith.addf %33, %36 : vector<32x1xf32>
    %38 = math.rsqrt %37 : vector<32x1xf32>
    %39 = vector.broadcast %38 : vector<32x1xf32> to vector<32x32xf32>
    %40 = arith.mulf %35, %39 : vector<32x32xf32>
    %41 = vector.broadcast %3 : vector<1x32xf32> to vector<32x32xf32>
    %42 = arith.mulf %40, %41 : vector<32x32xf32>
    %43 = vector.broadcast %4 : vector<1x32xf32> to vector<32x32xf32>
    %44 = arith.addf %42, %43 : vector<32x32xf32>
    %c32 = arith.constant 32 : index
    %c0_11 = arith.constant 0 : index
    %45 = vector.load %arg4[%c32, %c0_11] : memref<320x128xf32, #tpu.memory_space<vmem>>, vector<32x32xf32>
    %cst_12 = arith.constant dense<0.000000e+00> : vector<32x32xf32>
    %46 = tpu.matmul %44, %45, %cst_12 {dimension_numbers = #tpu.dot_dimension_numbers<[1], [0], [0], [1], [0, 0, 1, 1], [], []>} : vector<32x32xf32>, vector<32x32xf32>, vector<32x32xf32> -> vector<32x32xf32>
    %47 = vector.broadcast %6 : vector<1x32xf32> to vector<32x32xf32>
    %48 = arith.addf %46, %47 : vector<32x32xf32>
    %c64 = arith.constant 64 : index
    %c0_13 = arith.constant 0 : index
    %49 = vector.load %arg4[%c64, %c0_13] : memref<320x128xf32, #tpu.memory_space<vmem>>, vector<32x32xf32>
    %cst_14 = arith.constant dense<0.000000e+00> : vector<32x32xf32>
    %50 = tpu.matmul %44, %49, %cst_14 {dimension_numbers = #tpu.dot_dimension_numbers<[1], [0], [0], [1], [0, 0, 1, 1], [], []>} : vector<32x32xf32>, vector<32x32xf32>, vector<32x32xf32> -> vector<32x32xf32>
    %51 = vector.broadcast %7 : vector<1x32xf32> to vector<32x32xf32>
    %52 = arith.addf %50, %51 : vector<32x32xf32>
    %53 = vector.shape_cast %48 : vector<32x32xf32> to vector<2x16x32xf32>
    %54 = vector.shape_cast %52 : vector<32x32xf32> to vector<2x16x32xf32>
    %cst_15 = arith.constant dense<0.000000e+00> : vector<8xf32>
    %55 = vector.multi_reduction <add>, %22, %cst_15 [1] : vector<8x32xf32> to vector<8xf32>
    %56 = vector.shape_cast %55 : vector<8xf32> to vector<8x1xf32>
    %cst_16 = arith.constant 3.200000e+01 : f32
    %57 = vector.broadcast %cst_16 : f32 to vector<8x1xf32>
    %58 = arith.divf %56, %57 : vector<8x1xf32>
    %59 = vector.broadcast %58 : vector<8x1xf32> to vector<8x32xf32>
    %60 = arith.subf %22, %59 : vector<8x32xf32>
    %61 = arith.mulf %60, %60 : vector<8x32xf32>
    %cst_17 = arith.constant dense<0.000000e+00> : vector<8xf32>
    %62 = vector.multi_reduction <add>, %61, %cst_17 [1] : vector<8x32xf32> to vector<8xf32>
    %63 = vector.shape_cast %62 : vector<8xf32> to vector<8x1xf32>
    %cst_18 = arith.constant 3.200000e+01 : f32
    %64 = vector.broadcast %cst_18 : f32 to vector<8x1xf32>
    %65 = arith.divf %63, %64 : vector<8x1xf32>
    %66 = vector.broadcast %58 : vector<8x1xf32> to vector<8x32xf32>
    %67 = arith.subf %22, %66 : vector<8x32xf32>
    %cst_19 = arith.constant 9.99999974E-6 : f32
    %68 = vector.broadcast %cst_19 : f32 to vector<8x1xf32>
    %69 = arith.addf %65, %68 : vector<8x1xf32>
    %70 = math.rsqrt %69 : vector<8x1xf32>
    %71 = vector.broadcast %70 : vector<8x1xf32> to vector<8x32xf32>
    %72 = arith.mulf %67, %71 : vector<8x32xf32>
    %73 = vector.broadcast %8 : vector<1x32xf32> to vector<8x32xf32>
    %74 = arith.mulf %72, %73 : vector<8x32xf32>
    %75 = vector.broadcast %9 : vector<1x32xf32> to vector<8x32xf32>
    %76 = arith.addf %74, %75 : vector<8x32xf32>
    %c0_20 = arith.constant 0 : index
    %c0_21 = arith.constant 0 : index
    %77 = vector.load %arg4[%c0_20, %c0_21] : memref<320x128xf32, #tpu.memory_space<vmem>>, vector<32x32xf32>
    %cst_22 = arith.constant dense<0.000000e+00> : vector<8x32xf32>
    %78 = tpu.matmul %76, %77, %cst_22 {dimension_numbers = #tpu.dot_dimension_numbers<[1], [0], [0], [1], [0, 0, 1, 1], [], []>} : vector<8x32xf32>, vector<32x32xf32>, vector<8x32xf32> -> vector<8x32xf32>
    %79 = vector.broadcast %5 : vector<1x32xf32> to vector<8x32xf32>
    %80 = arith.addf %78, %79 : vector<8x32xf32>
    %81 = vector.shape_cast %80 : vector<8x32xf32> to vector<2x4x32xf32>
    "tpu.trace_start"() <{level = 10 : i32, message = "bid,bjd->bij"}> : () -> ()
    %cst_23 = arith.constant dense<0.000000e+00> : vector<2x4x16xf32>
    %82 = tpu.matmul %81, %53, %cst_23 {dimension_numbers = #tpu.dot_dimension_numbers<[2], [2], [1], [1], [0, 0, 0, 1, 1, 1], [0], [0]>} : vector<2x4x32xf32>, vector<2x16x32xf32>, vector<2x4x16xf32> -> vector<2x4x16xf32>
    "tpu.trace_stop"() : () -> ()
    %cst_24 = arith.constant dense<0xFF800000> : vector<2x16xf32>
    %83 = vector.multi_reduction <maximumf>, %82, %cst_24 [1] : vector<2x4x16xf32> to vector<2x16xf32>
    %84 = vector.shape_cast %83 : vector<2x16xf32> to vector<2x1x16xf32>
    %85 = vector.broadcast %84 : vector<2x1x16xf32> to vector<2x4x16xf32>
    %86 = arith.subf %82, %85 : vector<2x4x16xf32>
    %87 = math.exp %86 : vector<2x4x16xf32>
    %cst_25 = arith.constant dense<0.000000e+00> : vector<2x16xf32>
    %88 = vector.multi_reduction <add>, %87, %cst_25 [1] : vector<2x4x16xf32> to vector<2x16xf32>
    %89 = vector.shape_cast %88 : vector<2x16xf32> to vector<2x1x16xf32>
    %90 = tpu.reciprocal %89 {approx = true} : vector<2x1x16xf32> -> vector<2x1x16xf32>
    %91 = vector.broadcast %90 : vector<2x1x16xf32> to vector<2x4x16xf32>
    %92 = arith.mulf %87, %91 : vector<2x4x16xf32>
    %cst_26 = arith.constant 9.99999993E-9 : f32
    %93 = vector.broadcast %cst_26 : f32 to vector<2x4x16xf32>
    %94 = arith.addf %92, %93 : vector<2x4x16xf32>
    %cst_27 = arith.constant dense<0.000000e+00> : vector<2x4xf32>
    %95 = vector.multi_reduction <add>, %94, %cst_27 [2] : vector<2x4x16xf32> to vector<2x4xf32>
    %96 = vector.shape_cast %95 : vector<2x4xf32> to vector<2x4x1xf32>
    %97 = tpu.reciprocal %96 {approx = true} : vector<2x4x1xf32> -> vector<2x4x1xf32>
    %98 = vector.broadcast %97 : vector<2x4x1xf32> to vector<2x4x16xf32>
    %99 = arith.mulf %94, %98 : vector<2x4x16xf32>
    "tpu.trace_start"() <{level = 10 : i32, message = "bij,bjd->bid"}> : () -> ()
    %cst_28 = arith.constant dense<0.000000e+00> : vector<2x4x32xf32>
    %100 = tpu.matmul %99, %54, %cst_28 {dimension_numbers = #tpu.dot_dimension_numbers<[2], [1], [1], [2], [0, 0, 0, 1, 1, 2], [0], [0]>} : vector<2x4x16xf32>, vector<2x16x32xf32>, vector<2x4x32xf32> -> vector<2x4x32xf32>
    "tpu.trace_stop"() : () -> ()
    %101 = vector.shape_cast %100 : vector<2x4x32xf32> to vector<8x32xf32>
    %c96 = arith.constant 96 : index
    %c0_29 = arith.constant 0 : index
    %102 = vector.load %arg4[%c96, %c0_29] : memref<320x128xf32, #tpu.memory_space<vmem>>, vector<32x128xf32>
    %cst_30 = arith.constant dense<0.000000e+00> : vector<8x128xf32>
    %103 = tpu.matmul %101, %102, %cst_30 {dimension_numbers = #tpu.dot_dimension_numbers<[1], [0], [0], [1], [0, 0, 1, 1], [], []>} : vector<8x32xf32>, vector<32x128xf32>, vector<8x128xf32> -> vector<8x128xf32>
    %c128 = arith.constant 128 : index
    %c0_31 = arith.constant 0 : index
    %104 = vector.load %arg4[%c128, %c0_31] : memref<320x128xf32, #tpu.memory_space<vmem>>, vector<32x128xf32>
    %cst_32 = arith.constant dense<0.000000e+00> : vector<8x128xf32>
    %105 = tpu.matmul %22, %104, %cst_32 {dimension_numbers = #tpu.dot_dimension_numbers<[1], [0], [0], [1], [0, 0, 1, 1], [], []>} : vector<8x32xf32>, vector<32x128xf32>, vector<8x128xf32> -> vector<8x128xf32>
    %106 = arith.addf %103, %105 : vector<8x128xf32>
    %107 = vector.broadcast %10 : vector<1x128xf32> to vector<8x128xf32>
    %108 = arith.addf %106, %107 : vector<8x128xf32>
    %109 = vector.extract_strided_slice %108 {offsets = [0, 0], sizes = [8, 32], strides = [1, 1]} : vector<8x128xf32> to vector<8x32xf32>
    %110 = arith.negf %109 : vector<8x32xf32>
    %111 = math.exp %110 : vector<8x32xf32>
    %cst_33 = arith.constant 1.000000e+00 : f32
    %112 = vector.broadcast %cst_33 : f32 to vector<8x32xf32>
    %113 = arith.addf %112, %111 : vector<8x32xf32>
    %114 = arith.divf %112, %113 : vector<8x32xf32>
    %115 = vector.extract_strided_slice %108 {offsets = [0, 32], sizes = [8, 32], strides = [1, 1]} : vector<8x128xf32> to vector<8x32xf32>
    %116 = arith.negf %115 : vector<8x32xf32>
    %117 = math.exp %116 : vector<8x32xf32>
    %cst_34 = arith.constant 1.000000e+00 : f32
    %118 = vector.broadcast %cst_34 : f32 to vector<8x32xf32>
    %119 = arith.addf %118, %117 : vector<8x32xf32>
    %120 = arith.divf %118, %119 : vector<8x32xf32>
    %121 = vector.extract_strided_slice %108 {offsets = [0, 64], sizes = [8, 32], strides = [1, 1]} : vector<8x128xf32> to vector<8x32xf32>
    %122 = vector.extract_strided_slice %108 {offsets = [0, 96], sizes = [8, 32], strides = [1, 1]} : vector<8x128xf32> to vector<8x32xf32>
    %123 = arith.mulf %114, %122 : vector<8x32xf32>
    %124 = arith.addf %121, %123 : vector<8x32xf32>
    %125 = math.tanh %124 : vector<8x32xf32>
    %cst_35 = arith.constant 1.000000e+00 : f32
    %126 = vector.broadcast %cst_35 : f32 to vector<8x32xf32>
    %127 = arith.subf %126, %120 : vector<8x32xf32>
    %128 = arith.mulf %127, %125 : vector<8x32xf32>
    %129 = arith.mulf %120, %22 : vector<8x32xf32>
    %130 = arith.addf %128, %129 : vector<8x32xf32>
    %cst_36 = arith.constant dense<0.000000e+00> : vector<8xf32>
    %131 = vector.multi_reduction <add>, %130, %cst_36 [1] : vector<8x32xf32> to vector<8xf32>
    %132 = vector.shape_cast %131 : vector<8xf32> to vector<8x1xf32>
    %cst_37 = arith.constant 3.200000e+01 : f32
    %133 = vector.broadcast %cst_37 : f32 to vector<8x1xf32>
    %134 = arith.divf %132, %133 : vector<8x1xf32>
    %135 = vector.broadcast %134 : vector<8x1xf32> to vector<8x32xf32>
    %136 = arith.subf %130, %135 : vector<8x32xf32>
    %137 = arith.mulf %136, %136 : vector<8x32xf32>
    %cst_38 = arith.constant dense<0.000000e+00> : vector<8xf32>
    %138 = vector.multi_reduction <add>, %137, %cst_38 [1] : vector<8x32xf32> to vector<8xf32>
    %139 = vector.shape_cast %138 : vector<8xf32> to vector<8x1xf32>
    %cst_39 = arith.constant 3.200000e+01 : f32
    %140 = vector.broadcast %cst_39 : f32 to vector<8x1xf32>
    %141 = arith.divf %139, %140 : vector<8x1xf32>
    %142 = vector.broadcast %134 : vector<8x1xf32> to vector<8x32xf32>
    %143 = arith.subf %130, %142 : vector<8x32xf32>
    %cst_40 = arith.constant 9.99999974E-6 : f32
    %144 = vector.broadcast %cst_40 : f32 to vector<8x1xf32>
    %145 = arith.addf %141, %144 : vector<8x1xf32>
    %146 = math.rsqrt %145 : vector<8x1xf32>
    %147 = vector.broadcast %146 : vector<8x1xf32> to vector<8x32xf32>
    %148 = arith.mulf %143, %147 : vector<8x32xf32>
    %149 = vector.broadcast %11 : vector<1x32xf32> to vector<8x32xf32>
    %150 = arith.mulf %148, %149 : vector<8x32xf32>
    %151 = vector.broadcast %12 : vector<1x32xf32> to vector<8x32xf32>
    %152 = arith.addf %150, %151 : vector<8x32xf32>
    %c160 = arith.constant 160 : index
    %c0_41 = arith.constant 0 : index
    %153 = vector.load %arg4[%c160, %c0_41] : memref<320x128xf32, #tpu.memory_space<vmem>>, vector<32x128xf32>
    %cst_42 = arith.constant dense<0.000000e+00> : vector<8x128xf32>
    %154 = tpu.matmul %152, %153, %cst_42 {dimension_numbers = #tpu.dot_dimension_numbers<[1], [0], [0], [1], [0, 0, 1, 1], [], []>} : vector<8x32xf32>, vector<32x128xf32>, vector<8x128xf32> -> vector<8x128xf32>
    %155 = vector.broadcast %13 : vector<1x128xf32> to vector<8x128xf32>
    %156 = arith.addf %154, %155 : vector<8x128xf32>
    %cst_43 = arith.constant 0.000000e+00 : f32
    %157 = vector.broadcast %cst_43 : f32 to vector<8x128xf32>
    %158 = arith.maximumf %156, %157 : vector<8x128xf32>
    %c192 = arith.constant 192 : index
    %c0_44 = arith.constant 0 : index
    %159 = vector.load %arg4[%c192, %c0_44] : memref<320x128xf32, #tpu.memory_space<vmem>>, vector<128x32xf32>
    %cst_45 = arith.constant dense<0.000000e+00> : vector<8x32xf32>
    %160 = tpu.matmul %158, %159, %cst_45 {dimension_numbers = #tpu.dot_dimension_numbers<[1], [0], [0], [1], [0, 0, 1, 1], [], []>} : vector<8x128xf32>, vector<128x32xf32>, vector<8x32xf32> -> vector<8x32xf32>
    %161 = arith.addf %130, %160 : vector<8x32xf32>
    %162 = vector.broadcast %14 : vector<1x32xf32> to vector<8x32xf32>
    %163 = arith.addf %161, %162 : vector<8x32xf32>
    %cst_46 = arith.constant dense<0.000000e+00> : vector<8xf32>
    %164 = vector.multi_reduction <add>, %163, %cst_46 [1] : vector<8x32xf32> to vector<8xf32>
    %165 = vector.shape_cast %164 : vector<8xf32> to vector<8x1xf32>
    %cst_47 = arith.constant 3.200000e+01 : f32
    %166 = vector.broadcast %cst_47 : f32 to vector<8x1xf32>
    %167 = arith.divf %165, %166 : vector<8x1xf32>
    %168 = vector.broadcast %167 : vector<8x1xf32> to vector<8x32xf32>
    %169 = arith.subf %163, %168 : vector<8x32xf32>
    %170 = arith.mulf %169, %169 : vector<8x32xf32>
    %cst_48 = arith.constant dense<0.000000e+00> : vector<8xf32>
    %171 = vector.multi_reduction <add>, %170, %cst_48 [1] : vector<8x32xf32> to vector<8xf32>
    %172 = vector.shape_cast %171 : vector<8xf32> to vector<8x1xf32>
    %cst_49 = arith.constant 3.200000e+01 : f32
    %173 = vector.broadcast %cst_49 : f32 to vector<8x1xf32>
    %174 = arith.divf %172, %173 : vector<8x1xf32>
    %175 = vector.broadcast %167 : vector<8x1xf32> to vector<8x32xf32>
    %176 = arith.subf %163, %175 : vector<8x32xf32>
    %cst_50 = arith.constant 9.99999974E-6 : f32
    %177 = vector.broadcast %cst_50 : f32 to vector<8x1xf32>
    %178 = arith.addf %174, %177 : vector<8x1xf32>
    %179 = math.rsqrt %178 : vector<8x1xf32>
    %180 = vector.broadcast %179 : vector<8x1xf32> to vector<8x32xf32>
    %181 = arith.mulf %176, %180 : vector<8x32xf32>
    %182 = vector.broadcast %8 : vector<1x32xf32> to vector<8x32xf32>
    %183 = arith.mulf %181, %182 : vector<8x32xf32>
    %184 = vector.broadcast %9 : vector<1x32xf32> to vector<8x32xf32>
    %185 = arith.addf %183, %184 : vector<8x32xf32>
    %c0_51 = arith.constant 0 : index
    %c0_52 = arith.constant 0 : index
    %186 = vector.load %arg4[%c0_51, %c0_52] : memref<320x128xf32, #tpu.memory_space<vmem>>, vector<32x32xf32>
    %cst_53 = arith.constant dense<0.000000e+00> : vector<8x32xf32>
    %187 = tpu.matmul %185, %186, %cst_53 {dimension_numbers = #tpu.dot_dimension_numbers<[1], [0], [0], [1], [0, 0, 1, 1], [], []>} : vector<8x32xf32>, vector<32x32xf32>, vector<8x32xf32> -> vector<8x32xf32>
    %188 = vector.broadcast %5 : vector<1x32xf32> to vector<8x32xf32>
    %189 = arith.addf %187, %188 : vector<8x32xf32>
    %190 = vector.shape_cast %189 : vector<8x32xf32> to vector<2x4x32xf32>
    "tpu.trace_start"() <{level = 10 : i32, message = "bid,bjd->bij"}> : () -> ()
    %cst_54 = arith.constant dense<0.000000e+00> : vector<2x4x16xf32>
    %191 = tpu.matmul %190, %53, %cst_54 {dimension_numbers = #tpu.dot_dimension_numbers<[2], [2], [1], [1], [0, 0, 0, 1, 1, 1], [0], [0]>} : vector<2x4x32xf32>, vector<2x16x32xf32>, vector<2x4x16xf32> -> vector<2x4x16xf32>
    "tpu.trace_stop"() : () -> ()
    %cst_55 = arith.constant dense<0xFF800000> : vector<2x16xf32>
    %192 = vector.multi_reduction <maximumf>, %191, %cst_55 [1] : vector<2x4x16xf32> to vector<2x16xf32>
    %193 = vector.shape_cast %192 : vector<2x16xf32> to vector<2x1x16xf32>
    %194 = vector.broadcast %193 : vector<2x1x16xf32> to vector<2x4x16xf32>
    %195 = arith.subf %191, %194 : vector<2x4x16xf32>
    %196 = math.exp %195 : vector<2x4x16xf32>
    %cst_56 = arith.constant dense<0.000000e+00> : vector<2x16xf32>
    %197 = vector.multi_reduction <add>, %196, %cst_56 [1] : vector<2x4x16xf32> to vector<2x16xf32>
    %198 = vector.shape_cast %197 : vector<2x16xf32> to vector<2x1x16xf32>
    %199 = tpu.reciprocal %198 {approx = true} : vector<2x1x16xf32> -> vector<2x1x16xf32>
    %200 = vector.broadcast %199 : vector<2x1x16xf32> to vector<2x4x16xf32>
    %201 = arith.mulf %196, %200 : vector<2x4x16xf32>
    %cst_57 = arith.constant 9.99999993E-9 : f32
    %202 = vector.broadcast %cst_57 : f32 to vector<2x4x16xf32>
    %203 = arith.addf %201, %202 : vector<2x4x16xf32>
    %cst_58 = arith.constant dense<0.000000e+00> : vector<2x4xf32>
    %204 = vector.multi_reduction <add>, %203, %cst_58 [2] : vector<2x4x16xf32> to vector<2x4xf32>
    %205 = vector.shape_cast %204 : vector<2x4xf32> to vector<2x4x1xf32>
    %206 = tpu.reciprocal %205 {approx = true} : vector<2x4x1xf32> -> vector<2x4x1xf32>
    %207 = vector.broadcast %206 : vector<2x4x1xf32> to vector<2x4x16xf32>
    %208 = arith.mulf %203, %207 : vector<2x4x16xf32>
    "tpu.trace_start"() <{level = 10 : i32, message = "bij,bjd->bid"}> : () -> ()
    %cst_59 = arith.constant dense<0.000000e+00> : vector<2x4x32xf32>
    %209 = tpu.matmul %208, %54, %cst_59 {dimension_numbers = #tpu.dot_dimension_numbers<[2], [1], [1], [2], [0, 0, 0, 1, 1, 2], [0], [0]>} : vector<2x4x16xf32>, vector<2x16x32xf32>, vector<2x4x32xf32> -> vector<2x4x32xf32>
    "tpu.trace_stop"() : () -> ()
    %210 = vector.shape_cast %209 : vector<2x4x32xf32> to vector<8x32xf32>
    %c96_60 = arith.constant 96 : index
    %c0_61 = arith.constant 0 : index
    %211 = vector.load %arg4[%c96_60, %c0_61] : memref<320x128xf32, #tpu.memory_space<vmem>>, vector<32x128xf32>
    %cst_62 = arith.constant dense<0.000000e+00> : vector<8x128xf32>
    %212 = tpu.matmul %210, %211, %cst_62 {dimension_numbers = #tpu.dot_dimension_numbers<[1], [0], [0], [1], [0, 0, 1, 1], [], []>} : vector<8x32xf32>, vector<32x128xf32>, vector<8x128xf32> -> vector<8x128xf32>
    %c128_63 = arith.constant 128 : index
    %c0_64 = arith.constant 0 : index
    %213 = vector.load %arg4[%c128_63, %c0_64] : memref<320x128xf32, #tpu.memory_space<vmem>>, vector<32x128xf32>
    %cst_65 = arith.constant dense<0.000000e+00> : vector<8x128xf32>
    %214 = tpu.matmul %163, %213, %cst_65 {dimension_numbers = #tpu.dot_dimension_numbers<[1], [0], [0], [1], [0, 0, 1, 1], [], []>} : vector<8x32xf32>, vector<32x128xf32>, vector<8x128xf32> -> vector<8x128xf32>
    %215 = arith.addf %212, %214 : vector<8x128xf32>
    %216 = vector.broadcast %10 : vector<1x128xf32> to vector<8x128xf32>
    %217 = arith.addf %215, %216 : vector<8x128xf32>
    %218 = vector.extract_strided_slice %217 {offsets = [0, 0], sizes = [8, 32], strides = [1, 1]} : vector<8x128xf32> to vector<8x32xf32>
    %219 = arith.negf %218 : vector<8x32xf32>
    %220 = math.exp %219 : vector<8x32xf32>
    %cst_66 = arith.constant 1.000000e+00 : f32
    %221 = vector.broadcast %cst_66 : f32 to vector<8x32xf32>
    %222 = arith.addf %221, %220 : vector<8x32xf32>
    %223 = arith.divf %221, %222 : vector<8x32xf32>
    %224 = vector.extract_strided_slice %217 {offsets = [0, 32], sizes = [8, 32], strides = [1, 1]} : vector<8x128xf32> to vector<8x32xf32>
    %225 = arith.negf %224 : vector<8x32xf32>
    %226 = math.exp %225 : vector<8x32xf32>
    %cst_67 = arith.constant 1.000000e+00 : f32
    %227 = vector.broadcast %cst_67 : f32 to vector<8x32xf32>
    %228 = arith.addf %227, %226 : vector<8x32xf32>
    %229 = arith.divf %227, %228 : vector<8x32xf32>
    %230 = vector.extract_strided_slice %217 {offsets = [0, 64], sizes = [8, 32], strides = [1, 1]} : vector<8x128xf32> to vector<8x32xf32>
    %231 = vector.extract_strided_slice %217 {offsets = [0, 96], sizes = [8, 32], strides = [1, 1]} : vector<8x128xf32> to vector<8x32xf32>
    %232 = arith.mulf %223, %231 : vector<8x32xf32>
    %233 = arith.addf %230, %232 : vector<8x32xf32>
    %234 = math.tanh %233 : vector<8x32xf32>
    %cst_68 = arith.constant 1.000000e+00 : f32
    %235 = vector.broadcast %cst_68 : f32 to vector<8x32xf32>
    %236 = arith.subf %235, %229 : vector<8x32xf32>
    %237 = arith.mulf %236, %234 : vector<8x32xf32>
    %238 = arith.mulf %229, %163 : vector<8x32xf32>
    %239 = arith.addf %237, %238 : vector<8x32xf32>
    %cst_69 = arith.constant dense<0.000000e+00> : vector<8xf32>
    %240 = vector.multi_reduction <add>, %239, %cst_69 [1] : vector<8x32xf32> to vector<8xf32>
    %241 = vector.shape_cast %240 : vector<8xf32> to vector<8x1xf32>
    %cst_70 = arith.constant 3.200000e+01 : f32
    %242 = vector.broadcast %cst_70 : f32 to vector<8x1xf32>
    %243 = arith.divf %241, %242 : vector<8x1xf32>
    %244 = vector.broadcast %243 : vector<8x1xf32> to vector<8x32xf32>
    %245 = arith.subf %239, %244 : vector<8x32xf32>
    %246 = arith.mulf %245, %245 : vector<8x32xf32>
    %cst_71 = arith.constant dense<0.000000e+00> : vector<8xf32>
    %247 = vector.multi_reduction <add>, %246, %cst_71 [1] : vector<8x32xf32> to vector<8xf32>
    %248 = vector.shape_cast %247 : vector<8xf32> to vector<8x1xf32>
    %cst_72 = arith.constant 3.200000e+01 : f32
    %249 = vector.broadcast %cst_72 : f32 to vector<8x1xf32>
    %250 = arith.divf %248, %249 : vector<8x1xf32>
    %251 = vector.broadcast %243 : vector<8x1xf32> to vector<8x32xf32>
    %252 = arith.subf %239, %251 : vector<8x32xf32>
    %cst_73 = arith.constant 9.99999974E-6 : f32
    %253 = vector.broadcast %cst_73 : f32 to vector<8x1xf32>
    %254 = arith.addf %250, %253 : vector<8x1xf32>
    %255 = math.rsqrt %254 : vector<8x1xf32>
    %256 = vector.broadcast %255 : vector<8x1xf32> to vector<8x32xf32>
    %257 = arith.mulf %252, %256 : vector<8x32xf32>
    %258 = vector.broadcast %11 : vector<1x32xf32> to vector<8x32xf32>
    %259 = arith.mulf %257, %258 : vector<8x32xf32>
    %260 = vector.broadcast %12 : vector<1x32xf32> to vector<8x32xf32>
    %261 = arith.addf %259, %260 : vector<8x32xf32>
    %c160_74 = arith.constant 160 : index
    %c0_75 = arith.constant 0 : index
    %262 = vector.load %arg4[%c160_74, %c0_75] : memref<320x128xf32, #tpu.memory_space<vmem>>, vector<32x128xf32>
    %cst_76 = arith.constant dense<0.000000e+00> : vector<8x128xf32>
    %263 = tpu.matmul %261, %262, %cst_76 {dimension_numbers = #tpu.dot_dimension_numbers<[1], [0], [0], [1], [0, 0, 1, 1], [], []>} : vector<8x32xf32>, vector<32x128xf32>, vector<8x128xf32> -> vector<8x128xf32>
    %264 = vector.broadcast %13 : vector<1x128xf32> to vector<8x128xf32>
    %265 = arith.addf %263, %264 : vector<8x128xf32>
    %cst_77 = arith.constant 0.000000e+00 : f32
    %266 = vector.broadcast %cst_77 : f32 to vector<8x128xf32>
    %267 = arith.maximumf %265, %266 : vector<8x128xf32>
    %c192_78 = arith.constant 192 : index
    %c0_79 = arith.constant 0 : index
    %268 = vector.load %arg4[%c192_78, %c0_79] : memref<320x128xf32, #tpu.memory_space<vmem>>, vector<128x32xf32>
    %cst_80 = arith.constant dense<0.000000e+00> : vector<8x32xf32>
    %269 = tpu.matmul %267, %268, %cst_80 {dimension_numbers = #tpu.dot_dimension_numbers<[1], [0], [0], [1], [0, 0, 1, 1], [], []>} : vector<8x128xf32>, vector<128x32xf32>, vector<8x32xf32> -> vector<8x32xf32>
    %270 = arith.addf %239, %269 : vector<8x32xf32>
    %271 = vector.broadcast %14 : vector<1x32xf32> to vector<8x32xf32>
    %272 = arith.addf %270, %271 : vector<8x32xf32>
    %cst_81 = arith.constant dense<0.000000e+00> : vector<8xf32>
    %273 = vector.multi_reduction <add>, %272, %cst_81 [1] : vector<8x32xf32> to vector<8xf32>
    %274 = vector.shape_cast %273 : vector<8xf32> to vector<8x1xf32>
    %cst_82 = arith.constant 3.200000e+01 : f32
    %275 = vector.broadcast %cst_82 : f32 to vector<8x1xf32>
    %276 = arith.divf %274, %275 : vector<8x1xf32>
    %277 = vector.broadcast %276 : vector<8x1xf32> to vector<8x32xf32>
    %278 = arith.subf %272, %277 : vector<8x32xf32>
    %279 = arith.mulf %278, %278 : vector<8x32xf32>
    %cst_83 = arith.constant dense<0.000000e+00> : vector<8xf32>
    %280 = vector.multi_reduction <add>, %279, %cst_83 [1] : vector<8x32xf32> to vector<8xf32>
    %281 = vector.shape_cast %280 : vector<8xf32> to vector<8x1xf32>
    %cst_84 = arith.constant 3.200000e+01 : f32
    %282 = vector.broadcast %cst_84 : f32 to vector<8x1xf32>
    %283 = arith.divf %281, %282 : vector<8x1xf32>
    %284 = vector.broadcast %276 : vector<8x1xf32> to vector<8x32xf32>
    %285 = arith.subf %272, %284 : vector<8x32xf32>
    %cst_85 = arith.constant 9.99999974E-6 : f32
    %286 = vector.broadcast %cst_85 : f32 to vector<8x1xf32>
    %287 = arith.addf %283, %286 : vector<8x1xf32>
    %288 = math.rsqrt %287 : vector<8x1xf32>
    %289 = vector.broadcast %288 : vector<8x1xf32> to vector<8x32xf32>
    %290 = arith.mulf %285, %289 : vector<8x32xf32>
    %291 = vector.broadcast %8 : vector<1x32xf32> to vector<8x32xf32>
    %292 = arith.mulf %290, %291 : vector<8x32xf32>
    %293 = vector.broadcast %9 : vector<1x32xf32> to vector<8x32xf32>
    %294 = arith.addf %292, %293 : vector<8x32xf32>
    %c0_86 = arith.constant 0 : index
    %c0_87 = arith.constant 0 : index
    %295 = vector.load %arg4[%c0_86, %c0_87] : memref<320x128xf32, #tpu.memory_space<vmem>>, vector<32x32xf32>
    %cst_88 = arith.constant dense<0.000000e+00> : vector<8x32xf32>
    %296 = tpu.matmul %294, %295, %cst_88 {dimension_numbers = #tpu.dot_dimension_numbers<[1], [0], [0], [1], [0, 0, 1, 1], [], []>} : vector<8x32xf32>, vector<32x32xf32>, vector<8x32xf32> -> vector<8x32xf32>
    %297 = vector.broadcast %5 : vector<1x32xf32> to vector<8x32xf32>
    %298 = arith.addf %296, %297 : vector<8x32xf32>
    %299 = vector.shape_cast %298 : vector<8x32xf32> to vector<2x4x32xf32>
    "tpu.trace_start"() <{level = 10 : i32, message = "bid,bjd->bij"}> : () -> ()
    %cst_89 = arith.constant dense<0.000000e+00> : vector<2x4x16xf32>
    %300 = tpu.matmul %299, %53, %cst_89 {dimension_numbers = #tpu.dot_dimension_numbers<[2], [2], [1], [1], [0, 0, 0, 1, 1, 1], [0], [0]>} : vector<2x4x32xf32>, vector<2x16x32xf32>, vector<2x4x16xf32> -> vector<2x4x16xf32>
    "tpu.trace_stop"() : () -> ()
    %cst_90 = arith.constant dense<0xFF800000> : vector<2x16xf32>
    %301 = vector.multi_reduction <maximumf>, %300, %cst_90 [1] : vector<2x4x16xf32> to vector<2x16xf32>
    %302 = vector.shape_cast %301 : vector<2x16xf32> to vector<2x1x16xf32>
    %303 = vector.broadcast %302 : vector<2x1x16xf32> to vector<2x4x16xf32>
    %304 = arith.subf %300, %303 : vector<2x4x16xf32>
    %305 = math.exp %304 : vector<2x4x16xf32>
    %cst_91 = arith.constant dense<0.000000e+00> : vector<2x16xf32>
    %306 = vector.multi_reduction <add>, %305, %cst_91 [1] : vector<2x4x16xf32> to vector<2x16xf32>
    %307 = vector.shape_cast %306 : vector<2x16xf32> to vector<2x1x16xf32>
    %308 = tpu.reciprocal %307 {approx = true} : vector<2x1x16xf32> -> vector<2x1x16xf32>
    %309 = vector.broadcast %308 : vector<2x1x16xf32> to vector<2x4x16xf32>
    %310 = arith.mulf %305, %309 : vector<2x4x16xf32>
    %cst_92 = arith.constant 9.99999993E-9 : f32
    %311 = vector.broadcast %cst_92 : f32 to vector<2x4x16xf32>
    %312 = arith.addf %310, %311 : vector<2x4x16xf32>
    %cst_93 = arith.constant dense<0.000000e+00> : vector<2x4xf32>
    %313 = vector.multi_reduction <add>, %312, %cst_93 [2] : vector<2x4x16xf32> to vector<2x4xf32>
    %314 = vector.shape_cast %313 : vector<2x4xf32> to vector<2x4x1xf32>
    %315 = tpu.reciprocal %314 {approx = true} : vector<2x4x1xf32> -> vector<2x4x1xf32>
    %316 = vector.broadcast %315 : vector<2x4x1xf32> to vector<2x4x16xf32>
    %317 = arith.mulf %312, %316 : vector<2x4x16xf32>
    "tpu.trace_start"() <{level = 10 : i32, message = "bij,bjd->bid"}> : () -> ()
    %cst_94 = arith.constant dense<0.000000e+00> : vector<2x4x32xf32>
    %318 = tpu.matmul %317, %54, %cst_94 {dimension_numbers = #tpu.dot_dimension_numbers<[2], [1], [1], [2], [0, 0, 0, 1, 1, 2], [0], [0]>} : vector<2x4x16xf32>, vector<2x16x32xf32>, vector<2x4x32xf32> -> vector<2x4x32xf32>
    "tpu.trace_stop"() : () -> ()
    %319 = vector.shape_cast %318 : vector<2x4x32xf32> to vector<8x32xf32>
    %c96_95 = arith.constant 96 : index
    %c0_96 = arith.constant 0 : index
    %320 = vector.load %arg4[%c96_95, %c0_96] : memref<320x128xf32, #tpu.memory_space<vmem>>, vector<32x128xf32>
    %cst_97 = arith.constant dense<0.000000e+00> : vector<8x128xf32>
    %321 = tpu.matmul %319, %320, %cst_97 {dimension_numbers = #tpu.dot_dimension_numbers<[1], [0], [0], [1], [0, 0, 1, 1], [], []>} : vector<8x32xf32>, vector<32x128xf32>, vector<8x128xf32> -> vector<8x128xf32>
    %c128_98 = arith.constant 128 : index
    %c0_99 = arith.constant 0 : index
    %322 = vector.load %arg4[%c128_98, %c0_99] : memref<320x128xf32, #tpu.memory_space<vmem>>, vector<32x128xf32>
    %cst_100 = arith.constant dense<0.000000e+00> : vector<8x128xf32>
    %323 = tpu.matmul %272, %322, %cst_100 {dimension_numbers = #tpu.dot_dimension_numbers<[1], [0], [0], [1], [0, 0, 1, 1], [], []>} : vector<8x32xf32>, vector<32x128xf32>, vector<8x128xf32> -> vector<8x128xf32>
    %324 = arith.addf %321, %323 : vector<8x128xf32>
    %325 = vector.broadcast %10 : vector<1x128xf32> to vector<8x128xf32>
    %326 = arith.addf %324, %325 : vector<8x128xf32>
    %327 = vector.extract_strided_slice %326 {offsets = [0, 0], sizes = [8, 32], strides = [1, 1]} : vector<8x128xf32> to vector<8x32xf32>
    %328 = arith.negf %327 : vector<8x32xf32>
    %329 = math.exp %328 : vector<8x32xf32>
    %cst_101 = arith.constant 1.000000e+00 : f32
    %330 = vector.broadcast %cst_101 : f32 to vector<8x32xf32>
    %331 = arith.addf %330, %329 : vector<8x32xf32>
    %332 = arith.divf %330, %331 : vector<8x32xf32>
    %333 = vector.extract_strided_slice %326 {offsets = [0, 32], sizes = [8, 32], strides = [1, 1]} : vector<8x128xf32> to vector<8x32xf32>
    %334 = arith.negf %333 : vector<8x32xf32>
    %335 = math.exp %334 : vector<8x32xf32>
    %cst_102 = arith.constant 1.000000e+00 : f32
    %336 = vector.broadcast %cst_102 : f32 to vector<8x32xf32>
    %337 = arith.addf %336, %335 : vector<8x32xf32>
    %338 = arith.divf %336, %337 : vector<8x32xf32>
    %339 = vector.extract_strided_slice %326 {offsets = [0, 64], sizes = [8, 32], strides = [1, 1]} : vector<8x128xf32> to vector<8x32xf32>
    %340 = vector.extract_strided_slice %326 {offsets = [0, 96], sizes = [8, 32], strides = [1, 1]} : vector<8x128xf32> to vector<8x32xf32>
    %341 = arith.mulf %332, %340 : vector<8x32xf32>
    %342 = arith.addf %339, %341 : vector<8x32xf32>
    %343 = math.tanh %342 : vector<8x32xf32>
    %cst_103 = arith.constant 1.000000e+00 : f32
    %344 = vector.broadcast %cst_103 : f32 to vector<8x32xf32>
    %345 = arith.subf %344, %338 : vector<8x32xf32>
    %346 = arith.mulf %345, %343 : vector<8x32xf32>
    %347 = arith.mulf %338, %272 : vector<8x32xf32>
    %348 = arith.addf %346, %347 : vector<8x32xf32>
    %cst_104 = arith.constant dense<0.000000e+00> : vector<8xf32>
    %349 = vector.multi_reduction <add>, %348, %cst_104 [1] : vector<8x32xf32> to vector<8xf32>
    %350 = vector.shape_cast %349 : vector<8xf32> to vector<8x1xf32>
    %cst_105 = arith.constant 3.200000e+01 : f32
    %351 = vector.broadcast %cst_105 : f32 to vector<8x1xf32>
    %352 = arith.divf %350, %351 : vector<8x1xf32>
    %353 = vector.broadcast %352 : vector<8x1xf32> to vector<8x32xf32>
    %354 = arith.subf %348, %353 : vector<8x32xf32>
    %355 = arith.mulf %354, %354 : vector<8x32xf32>
    %cst_106 = arith.constant dense<0.000000e+00> : vector<8xf32>
    %356 = vector.multi_reduction <add>, %355, %cst_106 [1] : vector<8x32xf32> to vector<8xf32>
    %357 = vector.shape_cast %356 : vector<8xf32> to vector<8x1xf32>
    %cst_107 = arith.constant 3.200000e+01 : f32
    %358 = vector.broadcast %cst_107 : f32 to vector<8x1xf32>
    %359 = arith.divf %357, %358 : vector<8x1xf32>
    %360 = vector.broadcast %352 : vector<8x1xf32> to vector<8x32xf32>
    %361 = arith.subf %348, %360 : vector<8x32xf32>
    %cst_108 = arith.constant 9.99999974E-6 : f32
    %362 = vector.broadcast %cst_108 : f32 to vector<8x1xf32>
    %363 = arith.addf %359, %362 : vector<8x1xf32>
    %364 = math.rsqrt %363 : vector<8x1xf32>
    %365 = vector.broadcast %364 : vector<8x1xf32> to vector<8x32xf32>
    %366 = arith.mulf %361, %365 : vector<8x32xf32>
    %367 = vector.broadcast %11 : vector<1x32xf32> to vector<8x32xf32>
    %368 = arith.mulf %366, %367 : vector<8x32xf32>
    %369 = vector.broadcast %12 : vector<1x32xf32> to vector<8x32xf32>
    %370 = arith.addf %368, %369 : vector<8x32xf32>
    %c160_109 = arith.constant 160 : index
    %c0_110 = arith.constant 0 : index
    %371 = vector.load %arg4[%c160_109, %c0_110] : memref<320x128xf32, #tpu.memory_space<vmem>>, vector<32x128xf32>
    %cst_111 = arith.constant dense<0.000000e+00> : vector<8x128xf32>
    %372 = tpu.matmul %370, %371, %cst_111 {dimension_numbers = #tpu.dot_dimension_numbers<[1], [0], [0], [1], [0, 0, 1, 1], [], []>} : vector<8x32xf32>, vector<32x128xf32>, vector<8x128xf32> -> vector<8x128xf32>
    %373 = vector.broadcast %13 : vector<1x128xf32> to vector<8x128xf32>
    %374 = arith.addf %372, %373 : vector<8x128xf32>
    %cst_112 = arith.constant 0.000000e+00 : f32
    %375 = vector.broadcast %cst_112 : f32 to vector<8x128xf32>
    %376 = arith.maximumf %374, %375 : vector<8x128xf32>
    %c192_113 = arith.constant 192 : index
    %c0_114 = arith.constant 0 : index
    %377 = vector.load %arg4[%c192_113, %c0_114] : memref<320x128xf32, #tpu.memory_space<vmem>>, vector<128x32xf32>
    %cst_115 = arith.constant dense<0.000000e+00> : vector<8x32xf32>
    %378 = tpu.matmul %376, %377, %cst_115 {dimension_numbers = #tpu.dot_dimension_numbers<[1], [0], [0], [1], [0, 0, 1, 1], [], []>} : vector<8x128xf32>, vector<128x32xf32>, vector<8x32xf32> -> vector<8x32xf32>
    %379 = arith.addf %348, %378 : vector<8x32xf32>
    %380 = vector.broadcast %14 : vector<1x32xf32> to vector<8x32xf32>
    %381 = arith.addf %379, %380 : vector<8x32xf32>
    %382 = vector.shape_cast %381 : vector<8x32xf32> to vector<2x4x32xf32>
    %c0_116 = arith.constant 0 : index
    %c0_117 = arith.constant 0 : index
    %c0_118 = arith.constant 0 : index
    %383 = vector.load %arg5[%c0_116, %c0_117, %c0_118] : memref<2x4x32xf32, #tpu.memory_space<vmem>>, vector<2x4x32xf32>
    tpu.vector_store %arg5[%c0_116, %c0_117, %c0_118], %382 {strides = array<i32>} : memref<2x4x32xf32, #tpu.memory_space<vmem>>, vector<2x4x32xf32>,
    return
  }
  func.func @transform_0(%arg0: i32) -> (i32, i32, i32) {
    %c0_i32 = arith.constant 0 : i32
    %c0_i32_0 = arith.constant 0 : i32
    %c0_i32_1 = arith.constant 0 : i32
    return %arg0, %c0_i32, %c0_i32_0 : i32, i32, i32
  }
  func.func @transform_1(%arg0: i32) -> (i32, i32, i32) {
    %c0_i32 = arith.constant 0 : i32
    %c0_i32_0 = arith.constant 0 : i32
    %c0_i32_1 = arith.constant 0 : i32
    return %arg0, %c0_i32, %c0_i32_0 : i32, i32, i32
  }
  func.func @transform_2(%arg0: i32) -> (i32, i32) {
    %c0_i32 = arith.constant 0 : i32
    %c0_i32_0 = arith.constant 0 : i32
    %c0_i32_1 = arith.constant 0 : i32
    return %c0_i32, %c0_i32_0 : i32, i32
  }
  func.func @transform_3(%arg0: i32) -> (i32, i32) {
    %c0_i32 = arith.constant 0 : i32
    %c0_i32_0 = arith.constant 0 : i32
    %c0_i32_1 = arith.constant 0 : i32
    return %c0_i32, %c0_i32_0 : i32, i32
  }
  func.func @transform_4(%arg0: i32) -> (i32, i32, i32) {
    %c0_i32 = arith.constant 0 : i32
    %c0_i32_0 = arith.constant 0 : i32
    %c0_i32_1 = arith.constant 0 : i32
    return %arg0, %c0_i32, %c0_i32_0 : i32, i32, i32
  }
}

</mosaic_0001>

<bundles_post_ra>
// kernel: tpu_custom_call.1
= control target key start
LH: loop header
LB: loop body
LE: loop exit
PB: predicated region body
PF: predicated region fallthrough
CT: control target
= control target key end

     0   :  { %9 = vsyncpa [#allocation3], 0  ;;  %s2349_s0 = inlined_call_operand.hbm [shape: f32[2,16,32], index: 0, kind: input, shape index: {}]   ;;  %s2350_s1 = inlined_call_operand.hbm [shape: f32[2,4,32], index: 1, kind: input, shape index: {}]   ;;  %s2351_s2 = inlined_call_operand.hbm [shape: f32[14,128], index: 2, kind: input, shape index: {}]   ;;  %s2352_s3 = inlined_call_operand.hbm [shape: f32[320,128], index: 3, kind: input, shape index: {}]   ;;  %s2353_s4 = inlined_call_operand.hbm [shape: f32[2,4,32], index: 4, kind: output, shape index: {}]  }
   0x1   :  { %10 = vsyncpa [#allocation6], 0 }
   0x2   :  { %11 = vsyncpa [#allocation9], 0  ;;  %s30_s17 = sshll.u32 %s2350_s1, 4  ;;  %s31_s17 = int_to_ptr.hbm [resolvable:$true] %s30_s17 }
   0x3   :  { %12 = vsyncpa [#allocation4], 0  ;;  %s1834_s18 = smov [#allocation5]   ;;  %s17_s22 = sshll.u32 %s2349_s0, 4  ;;  %s18_s22 = int_to_ptr.hbm [resolvable:$true] %s17_s22 }
   0x4   :  { %s32_s19 = sshll.u32 %s1834_s18, 4  ;;  %s1835_s23 = smov 64   ;;  %s33_s19 = int_to_ptr.vmem [resolvable:$true] %s32_s19 }
   0x5   :  { %s1836_s24 = smov 4   ;;  %s1837_s25 = smov [#allocation2]  }
   0x6   :  { %38 = dma.hbm_to_vmem [thread:$0]  %s31_s17, 128, %s33_s19, [#allocation6], %s1835_s23, %s1835_s23, %s1836_s24  }
   0x7   :  { %s19_s26 = sshll.u32 %s1837_s25, 4  ;;  %s1838_s1 = smov 128   ;;  %s20_s26 = int_to_ptr.vmem [resolvable:$true] %s19_s26 }
   0x8   :  { %s1839_s27 = smov 8   ;;  %s43_s30 = sshll.u32 %s2351_s2, 4  ;;  %s44_s30 = int_to_ptr.hbm [resolvable:$true] %s43_s30 }
   0x9   :  { %25 = dma.hbm_to_vmem [thread:$0]  %s18_s22, 512, %s20_s26, [#allocation3], %s1838_s1, %s1838_s1, %s1839_s27  }
   0xa   :  { %s1840_s5 = smov [#allocation7]   ;;  %s56_s8 = sshll.u32 %s2352_s3, 4  ;;  %s57_s8 = int_to_ptr.hbm [resolvable:$true] %s56_s8 }
   0xb   :  { %s45_s0 = sshll.u32 %s1840_s5, 4  ;;  %s1841_s9 = smov [#allocation8]   ;;  %s46_s0 = int_to_ptr.vmem [resolvable:$true] %s45_s0 }
   0xc   :  { %51 = dma.hbm_to_vmem [thread:$0]  %s44_s30, 256, %s46_s0, [#allocation6], %s1838_s1, %s1838_s1, %s1839_s27  }
   0xd   :  { %s58_s10 = sshll.u32 %s1841_s9, 4  ;;  %s59_s10 = int_to_ptr.vmem [resolvable:$true] %s58_s10 }
   0xe   :  { %64 = dma.hbm_to_vmem [thread:$0]  %s57_s8, 5120, %s59_s10, [#allocation9], %s1838_s1, %s1838_s1, %s1839_s27  }
   0xf   :  { %1826 = dma.done.wait [#allocation3], 512  }
  0x10   :  { %1827 = vsyncadd [#allocation3], 4294966784 }
  0x11   :  { %1828 = dma.done.wait [#allocation6], 384  }
  0x12   :  { %1829 = vsyncadd [#allocation6], 4294966912 }
  0x13   :  { %1830 = dma.done.wait [#allocation9], 5120  }
  0x14   :  { %1831 = vsyncadd [#allocation9], 4294962176  ;;  %vm100_vm0 = vcmask 261120   ;;  %v85_v0 = vld [vmem:[#allocation2 + $0x10] sm:$0xff]  ;;  %v83_v1 = vld [vmem:[#allocation2] sm:$0xff]  ;;  %v1842_v17 = vmov 32.0  }
  0x15   :  { %v107_v2 = vsel %vm100_vm0, %v85_v0, 0.0  ;;  %v101_v3 = vsel %vm100_vm0, %v83_v1, 0.0  ;;  %v87_v4 = vld [vmem:[#allocation5] sm:$0xf]  ;;  %v88_v5 = vld [vmem:[#allocation5 + $0x4] sm:$0xf]  ;;  %1630 = vrcp.f32 %v1842_v17 }
  0x16   :  { %108 = vadd.xlane.f32.xlu1 %v107_v2  ;;  %102 = vadd.xlane.f32.xlu0 %v101_v3  ;;  %92 = vst [vmem:[#allocation1] ss:$2 sm:$0xff] %v87_v4  ;;  %v86_v6 = vld [vmem:[#allocation2 + $0x18] sm:$0xff]  ;;  %v84_v7 = vld [vmem:[#allocation2 + $0x8] sm:$0xff]  ;;  %v209_v49 = vld [vmem:[#allocation8 + $0x38] sm:$0xff]  ;;  %s1843_s2 = smov 32  }
  0x17   :  { %94 = vst [vmem:[#allocation1 + $0x1] ss:$2 sm:$0xff] %v88_v5  ;;  %v1888_v8 = vld [vmem:[#allocation7] sm:$0xff]  ;;  %v110_v9 = vsel %vm100_vm0, %v86_v6, 0.0  ;;  %v104_v10 = vsel %vm100_vm0, %v84_v7, 0.0  ;;  %v255_v50 = vld [vmem:[#allocation8 + $0x58] sm:$0xff]  ;;  %235 = vmatpush.msra.mxu0 %v209_v49 }
  0x18   :  { %111 = vadd.xlane.f32.xlu2 %v110_v9  ;;  %v89_v11 = vperm.slane %v1888_v8, 1  ;;  %v98_v12 = vperm.slane %v1888_v8, 0  ;;  %269 = vmatpush.msra.mxu1 %v255_v50  ;;  %v208_v51 = vld [vmem:[#allocation8 + $0x30] sm:$0xff]  ;;  %v207_v53 = vld [vmem:[#allocation8 + $0x28] sm:$0xff]  ;;  %v206_v55 = vld [vmem:[#allocation8 + $0x20] sm:$0xff]  ;;  %s1844_s3 = smov 96  }
  0x19   :  { %v254_v52 = vld [vmem:[#allocation8 + $0x50] sm:$0xff]  ;;  %236 = vmatpush.msra.mxu0 %v208_v51  ;;  %v253_v54 = vld [vmem:[#allocation8 + $0x48] sm:$0xff]  ;;  %v252_v56 = vld [vmem:[#allocation8 + $0x40] sm:$0xff]  ;;  %s1845_s11 = smov [#allocation10]   ;;  %s1556_s15 = sshll.u32 %s2353_s4, 4  ;;  %s1557_s15 = int_to_ptr.hbm [resolvable:$true] %s1556_s15 }
  0x1a   :  { %270 = vmatpush.msra.mxu1 %v254_v52  ;;  %v1935_v63 = vld [vmem:[#allocation8 + $0x18] sm:$0xff]  ;;  %v1946_v2 = vld [vmem:[#allocation8] sm:$0xff]  ;;  %s1554_s12 = sshll.u32 %s1845_s11, 4  ;;  %s1555_s12 = int_to_ptr.vmem [resolvable:$true] %s1554_s12 }
  0x1b   :  { %v1631_v18 = vpop.eup %1630  ;;  %237 = vmatpush.msra.mxu0 %v207_v53  ;;  %332 = vmatpush.msra.mxu2 %v1935_v63 }
  0x1c   :  { %v114_v19 = vmul.f32 32.0, %v1631_v18  ;;  %vm118_vm1 = vweird.f32 %v1631_v18  ;;  %271 = vmatpush.msra.mxu1 %v253_v54 }
  0x1d   :  { %238 = vmatpush.msra.mxu0 %v206_v55 }
  0x1e   :  { %105 = vadd.xlane.f32.xlu0 %v104_v10  ;;  %v95_v13 = vld.sshfl [vmem:[#allocation1] sm:$0xff pattern:$0x75316420]  ;;  %v115_v20 = vsub.f32 1.0, %v114_v19  ;;  %272 = vmatpush.msra.mxu1 %v252_v56 }
  0x1f   :  { %v97_v14 = vmul.f32 %v95_v13, %v89_v11 }
  0x20   :  { %v116_v21 = vmul.f32 %v1631_v18, %v115_v20  ;;  %779 = vmatpush.msrb.mxu1 %v1935_v63 }
  0x21   :  { %v1894_v15 = vadd.f32 %v98_v12, %v97_v14 }
  0x22   :  { %v117_v22 = vadd.f32 %v1631_v18, %v116_v21 }
  0x23   :  { %v286_v16 = vsel %vm100_vm0, %v1894_v15, 0.0 }
  0x24   :  { %287 = vadd.xlane.f32.xlu1 %v286_v16  ;;  %v1898_v23 = vsel %vm118_vm1, %v1631_v18, %v117_v22 }
  0x89   :  { %v109_v24 = vpop.xlane.xlu1 %108  ;;  %v103_v25 = vpop.xlane.xlu0 %102 }
  0x8a   :  { %v122_v26 = vmul.f32 %v1898_v23, %v109_v24  ;;  %v120_v27 = vmul.f32 %v1898_v23, %v103_v25 }
  0x8b   :  { %v112_v32 = vpop.xlane.xlu2 %111 }
  0x8c   :  { %v1902_v28 = vsub.f32 %v85_v0, %v122_v26  ;;  %v1904_v29 = vsub.f32 %v83_v1, %v120_v27  ;;  %v123_v37 = vmul.f32 %v1898_v23, %v112_v32  ;;  %v1939_v0 = vld [vmem:[#allocation8 + $0x10] sm:$0xff]  ;;  %v1943_v1 = vld [vmem:[#allocation8 + $0x8] sm:$0xff]  ;;  %v1961_v27 = vperm.slane %v1888_v8, 2 }
  0x8d   :  { %333 = vmatpush.msra.mxu2 %v1939_v0  ;;  %780 = vmatpush.msrb.mxu1 %v1939_v0 }
  0x8e   :  { %v128_v30 = vmul.f32 %v1904_v29, %v1904_v29  ;;  %v130_v31 = vmul.f32 %v1902_v28, %v1902_v28  ;;  %v1916_v39 = vsub.f32 %v86_v6, %v123_v37 }
  0x8f   :  { %334 = vmatpush.msra.mxu2 %v1943_v1  ;;  %781 = vmatpush.msrb.mxu1 %v1943_v1 }
  0x90   :  { %v132_v33 = vsel %vm100_vm0, %v128_v30, 0.0  ;;  %v138_v34 = vsel %vm100_vm0, %v130_v31, 0.0  ;;  %v131_v45 = vmul.f32 %v1916_v39, %v1916_v39  ;;  %v1963_v30 = vld [vmem:[#allocation8 + $0x138] sm:$0xff]  ;;  %v1965_v31 = vld [vmem:[#allocation8 + $0x130] sm:$0xff] }
  0x91   :  { %133 = vadd.xlane.f32.xlu2 %v132_v33  ;;  %v106_v35 = vpop.xlane.xlu0 %105  ;;  %139 = vadd.xlane.f32.xlu1 %v138_v34 }
  0x92   :  { %v121_v36 = vmul.f32 %v1898_v23, %v106_v35  ;;  %v141_v48 = vsel %vm100_vm0, %v131_v45, 0.0  ;;  %335 = vmatpush.msra.mxu2 %v1946_v2  ;;  %782 = vmatpush.msrb.mxu1 %v1946_v2  ;;  %v201_v35 = vperm.slane %v1888_v8, 3 }
  0x93   :  { %687 = vmatpush.msrb.mxu0 %v1963_v30 }
  0x94   :  { %v1914_v38 = vsub.f32 %v84_v7, %v121_v36 }
  0x95   :  { %688 = vmatpush.msrb.mxu0 %v1965_v31 }
  0x96   :  { %v129_v40 = vmul.f32 %v1914_v38, %v1914_v38 }
  0x97   :  { %v288_v41 = vpop.xlane.xlu1 %287 }
  0x98   :  { %v289_v42 = vmul.f32 %v288_v41, %v1898_v23  ;;  %v135_v43 = vsel %vm100_vm0, %v129_v40, 0.0 }
  0x99   :  { %136 = vadd.xlane.f32.xlu0 %v135_v43 }
  0x9a   :  { %v1923_v44 = vsub.f32 %v1894_v15, %v289_v42 }
  0x9c   :  { %v291_v46 = vmul.f32 %v1923_v44, %v1923_v44 }
  0x9e   :  { %v292_v47 = vsel %vm100_vm0, %v291_v46, 0.0 }
  0x9f   :  { %293 = vadd.xlane.f32.xlu2 %v292_v47 }
  0xa1   :  { %142 = vadd.xlane.f32.xlu0 %v141_v48 }
 0x104   :  { %v134_v57 = vpop.xlane.xlu2 %133  ;;  %v140_v58 = vpop.xlane.xlu1 %139 }
 0x105   :  { %v144_v59 = vmul.f32 %v134_v57, %v1898_v23  ;;  %v146_v60 = vmul.f32 %v140_v58, %v1898_v23 }
 0x107   :  { %v148_v61 = vadd.f32 1e-05, %v144_v59  ;;  %v1933_v62 = vadd.f32 1e-05, %v146_v60 }
 0x109   :  { %1632 = vrsqrt.f32 %v148_v61  ;;  %vm158_vm3 = vweird.f32 %v148_v61  ;;  %vm178_vm5 = vweird.f32 %v1933_v62 }
 0x10a   :  { %1634 = vrsqrt.f32 %v1933_v62 }
 0x10c   :  { %v137_v3 = vpop.xlane.xlu0 %136 }
 0x10d   :  { %v145_v4 = vmul.f32 %v137_v3, %v1898_v23  ;;  %v308_v3 = vperm.slane %v1888_v8, 7 }
 0x10f   :  { %v1633_v5 = vpop.eup %1632  ;;  %v149_v6 = vadd.f32 1e-05, %v145_v4 }
 0x110   :  { %v1953_v7 = vpop.eup %1634  ;;  %v153_v9 = vmul.f32 %v1633_v5, %v148_v61  ;;  %vm159_vm2 = vweird.f32 %v1633_v5  ;;  %v1986_v61 = vld [vmem:[#allocation7 + $0x8] sm:$0x3f] }
 0x111   :  { %v173_v10 = vmul.f32 %v1953_v7, %v1933_v62  ;;  %1636 = vrsqrt.f32 %v149_v6  ;;  %vm160_vm4 = vmor %vm158_vm3, %vm159_vm2  ;;  %vm179_vm6 = vweird.f32 %v1953_v7  ;;  %vm168_vm8 = vweird.f32 %v149_v6 }
 0x112   :  { %v154_v11 = vmul.f32 %v1633_v5, %v153_v9  ;;  %v294_v12 = vpop.xlane.xlu2 %293  ;;  %vm1975_vm9 = vmor %vm178_vm5, %vm179_vm6  ;;  %vm398_vm2 = vcmask 125952   ;;  %vm449_vm3 = vcmask 130048  }
 0x113   :  { %v295_v13 = vmul.f32 %v294_v12, %v1898_v23  ;;  %v174_v16 = vmul.f32 %v1953_v7, %v173_v10 }
 0x114   :  { %v155_v14 = vmul.f32 0.5, %v154_v11  ;;  %v143_v17 = vpop.xlane.xlu0 %142 }
 0x115   :  { %v296_v18 = vadd.f32 1e-05, %v295_v13  ;;  %v147_v19 = vmul.f32 %v143_v17, %v1898_v23  ;;  %v175_v25 = vmul.f32 0.5, %v174_v16  ;;  %v2006_v16 = vld [vmem:[#allocation8 + $0x128] sm:$0xff]  ;;  %v2008_v17 = vld [vmem:[#allocation8 + $0x120] sm:$0xff] }
 0x116   :  { %v156_v20 = vsub.f32 1.5, %v155_v14  ;;  %689 = vmatpush.msrb.mxu0 %v2006_v16 }
 0x117   :  { %v1637_v21 = vpop.eup %1636  ;;  %1638 = vrsqrt.f32 %v296_v18  ;;  %v151_v22 = vadd.f32 1e-05, %v147_v19  ;;  %v176_v36 = vsub.f32 1.5, %v175_v25  ;;  %vm303_vm11 = vweird.f32 %v296_v18  ;;  %v2018_v19 = vld [vmem:[#allocation8 + $0x108] sm:$0xff]  ;;  %v2033_v25 = vld [vmem:[#allocation8 + $0xe0] sm:$0xff] }
 0x118   :  { %v157_v24 = vmul.f32 %v1633_v5, %v156_v20  ;;  %v163_v26 = vmul.f32 %v1637_v21, %v149_v6  ;;  %vm169_vm7 = vweird.f32 %v1637_v21  ;;  %690 = vmatpush.msrb.mxu0 %v2008_v17  ;;  %v2020_v20 = vld [vmem:[#allocation8 + $0x100] sm:$0xff] }
 0x119   :  { %1640 = vrsqrt.f32 %v151_v22  ;;  %vm170_vm10 = vmor %vm168_vm8, %vm169_vm7  ;;  %vm188_vm14 = vweird.f32 %v151_v22 }
 0x11a   :  { %v161_v32 = vsel %vm160_vm4, %v1633_v5, %v157_v24  ;;  %v164_v33 = vmul.f32 %v1637_v21, %v163_v26  ;;  %v2030_v24 = vld [vmem:[#allocation8 + $0xe8] sm:$0xff]  ;;  %v2036_v26 = vld [vmem:[#allocation8 + $0xd8] sm:$0xff] }
 0x11b   :  { %v192_v34 = vmul.f32 %v161_v32, %v1904_v29  ;;  %v177_v29 = vmul.f32 %v1953_v7, %v176_v36  ;;  %v2042_v32 = vld [vmem:[#allocation8 + $0xc8] sm:$0xff]  ;;  %v210_v36 = vperm.slane %v1888_v8, 5 }
 0x11c   :  { %v165_v37 = vmul.f32 0.5, %v164_v33  ;;  %v2044_v33 = vld [vmem:[#allocation8 + $0xc0] sm:$0xff] }
 0x11d   :  { %v1639_v40 = vpop.eup %1638  ;;  %v197_v41 = vmul.f32 %v1961_v27, %v192_v34  ;;  %v181_v55 = vsel %vm1975_vm9, %v1953_v7, %v177_v29  ;;  %v310_v7 = vperm.slane %v1986_v61, 0 }
 0x11e   :  { %v166_v42 = vsub.f32 1.5, %v165_v37  ;;  %v298_v43 = vmul.f32 %v1639_v40, %v296_v18  ;;  %vm304_vm12 = vweird.f32 %v1639_v40  ;;  %v194_v4 = vmul.f32 %v181_v55, %v1902_v28  ;;  %v2011_v18 = vld [vmem:[#allocation8 + $0x118] sm:$0xff] }
 0x11f   :  { %v1641_v45 = vpop.eup %1640  ;;  %v202_v46 = vadd.f32 %v201_v35, %v197_v41  ;;  %vm305_vm13 = vmor %vm303_vm11, %vm304_vm12  ;;  %691 = vmatpush.msrb.mxu0 %v2011_v18 }
 0x120   :  { %v167_v48 = vmul.f32 %v1637_v21, %v166_v42  ;;  %v299_v49 = vmul.f32 %v1639_v40, %v298_v43  ;;  %v183_v50 = vmul.f32 %v1641_v45, %v151_v22  ;;  %vm189_vm15 = vweird.f32 %v1641_v45  ;;  %v2026_v22 = vld [vmem:[#allocation8 + $0xf0] sm:$0xff] }
 0x121   :  { %1571 = vmatmul.msk.f32.vlgmr.msra.gmra.mxu0 %vm100_vm0, %v202_v46  ;;  %1575 = vmatmul.msk.f32.vlgmr.msra.gmra.mxu1 %vm100_vm0, %v202_v46  ;;  %vm190_vm1 = vmor %vm188_vm14, %vm189_vm15  ;;  %v199_v10 = vmul.f32 %v1961_v27, %v194_v4  ;;  %v256_v42 = vperm.slane %v1888_v8, 6 }
 0x122   :  { %v171_v51 = vsel %vm170_vm10, %v1637_v21, %v167_v48  ;;  %v300_v52 = vmul.f32 0.5, %v299_v49  ;;  %v184_v53 = vmul.f32 %v1641_v45, %v183_v50  ;;  %v2023_v21 = vld [vmem:[#allocation8 + $0xf8] sm:$0xff]  ;;  %v2064_v48 = vperm.slane %v1888_v8, 4 }
 0x123   :  { %v193_v54 = vmul.f32 %v171_v51, %v1914_v38  ;;  %v204_v12 = vadd.f32 %v201_v35, %v199_v10 }
 0x124   :  { %v301_v56 = vsub.f32 1.5, %v300_v52  ;;  %v185_v57 = vmul.f32 0.5, %v184_v53 }
 0x125   :  { %v198_v58 = vmul.f32 %v1961_v27, %v193_v54 }
 0x126   :  { %v302_v59 = vmul.f32 %v1639_v40, %v301_v56  ;;  %v186_v60 = vsub.f32 1.5, %v185_v57 }
 0x127   :  { %v203_v62 = vadd.f32 %v201_v35, %v198_v58 }
 0x128   :  { %v306_v38 = vsel %vm305_vm13, %v1639_v40, %v302_v59  ;;  %v187_v5 = vmul.f32 %v1641_v45, %v186_v60 }
 0x129   :  { %1572 = vmatmul.msk.f32.gmra.mxu0 %vm100_vm0, %v203_v62  ;;  %1576 = vmatmul.msk.f32.gmra.mxu1 %vm100_vm0, %v203_v62  ;;  %v307_v6 = vmul.f32 %v306_v38, %v1923_v44 }
 0x12a   :  { %v191_v11 = vsel %vm190_vm1, %v1641_v45, %v187_v5 }
 0x12b   :  { %v309_v9 = vmul.f32 %v308_v3, %v307_v6  ;;  %v195_v13 = vmul.f32 %v191_v11, %v1916_v39  ;;  %v2014_v39 = vld [vmem:[#allocation8 + $0x110] sm:$0xff] }
 0x12c   :  { %692 = vmatpush.msrb.mxu0 %v2014_v39 }
 0x12d   :  { %v311_v28 = vadd.f32 %v310_v7, %v309_v9  ;;  %v200_v44 = vmul.f32 %v1961_v27, %v195_v13  ;;  %v2039_v27 = vld [vmem:[#allocation8 + $0xd0] sm:$0xff] }
 0x12e   :  { %693 = vmatpush.msrb.mxu0 %v2018_v19 }
 0x12f   :  { %1579 = vmatmul.msk.f32.vlgmr.msra.gmra.mxu2 %vm100_vm0, %v311_v28  ;;  %v205_v14 = vadd.f32 %v201_v35, %v200_v44 }
 0x130   :  { %694 = vmatpush.msrb.mxu0 %v2020_v20 }
 0x131   :  { %1573 = vmatmul.msk.f32.gmra.mxu0 %vm100_vm0, %v204_v12  ;;  %1577 = vmatmul.msk.f32.gmra.mxu1 %vm100_vm0, %v204_v12 }
 0x132   :  { %695 = vmatpush.msrb.mxu0 %v2023_v21 }
 0x134   :  { %696 = vmatpush.msrb.mxu0 %v2026_v22 }
 0x136   :  { %697 = vmatpush.msrb.mxu0 %v2030_v24 }
 0x138   :  { %698 = vmatpush.msrb.mxu0 %v2033_v25 }
 0x139   :  { %1574 = vmatmul.msk.f32.gmra.mxu0 %vm100_vm0, %v205_v14  ;;  %1578 = vmatmul.msk.f32.gmra.mxu1 %vm100_vm0, %v205_v14 }
 0x13a   :  { %699 = vmatpush.msrb.mxu0 %v2036_v26 }
 0x13c   :  { %700 = vmatpush.msrb.mxu0 %v2039_v27 }
 0x13e   :  { %701 = vmatpush.msrb.mxu0 %v2042_v32 }
 0x140   :  { %702 = vmatpush.msrb.mxu0 %v2044_v33 }
 0x19e   :  { %v240_v34 = vpop.f32.mrf.mxu0  ;;  %v274_v35 = vpop.f32.mrf.mxu1 }
 0x19f   :  { %v2054_v43 = vadd.f32 %v240_v34, %v210_v36  ;;  %v2060_v46 = vadd.f32 %v274_v35, %v256_v42 }
 0x1a6   :  { %v243_v37 = vpop.f32.mrf.mxu0  ;;  %v277_v40 = vpop.f32.mrf.mxu1 }
 0x1a7   :  { %v2049_v41 = vadd.f32 %v243_v37, %v210_v36  ;;  %v2056_v45 = vadd.f32 %v277_v40, %v256_v42 }
 0x1a9   :  { %1580 = vmatpush.xpose.msk.msra.mxu3 %vm100_vm0, %v2049_v41 }
 0x1ad   :  { %1581 = vmatpush.xpose.msk.msra.mxu3 %vm100_vm0, %v2054_v43 }
 0x1ae   :  { %v246_v29 = vpop.f32.mrf.mxu0  ;;  %v280_v47 = vpop.f32.mrf.mxu1 }
 0x1af   :  { %v2073_v55 = vadd.f32 %v280_v47, %v256_v42  ;;  %v2080_v56 = vadd.f32 %v246_v29, %v210_v36 }
 0x1b1   :  { %467 = vmatpush.msrb.mxu3 %v2056_v45 }
 0x1b2   :  { %v337_v49 = vpop.f32.mrf.mxu2 }
 0x1b3   :  { %468 = vmatpush.msrb.mxu3 %v2060_v46  ;;  %v338_v50 = vadd.f32 %v337_v49, %v2064_v48 }
 0x1b5   :  { %1582 = vmatmul.msk.f32.vlgmr.msra.gmra.mxu3 %vm100_vm0, %v338_v50  ;;  %v341_v57 = vrot.slane %v338_v50, 4 }
 0x1b6   :  { %v249_v51 = vpop.f32.mrf.mxu0  ;;  %v283_v52 = vpop.f32.mrf.mxu1 }
 0x1b7   :  { %v2069_v53 = vadd.f32 %v249_v51, %v210_v36  ;;  %v2071_v54 = vadd.f32 %v283_v52, %v256_v42 }
 0x1b9   :  { %1583 = vmatpush.xpose.msk.msrb.mxu2 %vm100_vm0, %v2069_v53  ;;  %923 = vmatpush.msra.mxu1 %v2071_v54 }
 0x1ba   :  { %1609 = vmatpush.xpose.msk.msra.mxu0 %vm100_vm0, %v2069_v53 }
 0x1bb   :  { %924 = vmatpush.msra.mxu1 %v2073_v55 }
 0x1bd   :  { %1584 = vmatpush.xpose.msk.msrb.mxu2 %vm100_vm0, %v2080_v56 }
 0x1be   :  { %1610 = vmatpush.xpose.msk.msra.mxu0 %vm100_vm0, %v2080_v56 }
 0x1c0   :  { %1585 = vmatmul.msk.f32.vlgmr.msrb.gmra.mxu2 %vm100_vm0, %v341_v57 }
 0x1c1   :  { %490 = vmatpush.msra.mxu2 %v2071_v54 }
 0x1c3   :  { %491 = vmatpush.msra.mxu2 %v2073_v55 }
 0x238   :  { %v367_v58 = vpop.f32.mrf.mxu3 }
 0x239   :  { %v399_v59 = vsel %vm398_vm2, %v367_v58, -inf }
 0x23a   :  { %v400_v60 = vrot.slane %v399_v59, 4 }
 0x23c   :  { %v401_v62 = vmax.f32 %v399_v59, %v400_v60 }
 0x23e   :  { %v402_v4 = vrot.slane %v401_v62, 2 }
 0x240   :  { %v403_v38 = vmax.f32 %v401_v62, %v402_v4 }
 0x242   :  { %v404_v5 = vrot.slane %v403_v38, 1 }
 0x243   :  { %v395_v6 = vpop.f32.mrf.mxu2 }
 0x244   :  { %v405_v9 = vmax.f32 %v403_v38, %v404_v5  ;;  %v406_v10 = vsel %vm398_vm2, %v395_v6, -inf }
 0x245   :  { %v407_v11 = vrot.slane %v406_v10, 4 }
 0x246   :  { %v413_v28 = vsub.f32 %v367_v58, %v405_v9 }
 0x247   :  { %v408_v12 = vmax.f32 %v406_v10, %v407_v11 }
 0x248   :  { %v415_v13 = vmul.f32 1.442695, %v413_v28 }
 0x249   :  { %v409_v44 = vrot.slane %v408_v12, 2 }
 0x24a   :  { %1642 = vpow2.f32 %v415_v13 }
 0x24b   :  { %v410_v14 = vmax.f32 %v408_v12, %v409_v44 }
 0x24d   :  { %v411_v34 = vrot.slane %v410_v14, 1 }
 0x24f   :  { %v412_v35 = vmax.f32 %v410_v14, %v411_v34  ;;  %v2096_v14 = vld [vmem:[#allocation8 + $0x98] sm:$0xff]  ;;  %v2098_v34 = vld [vmem:[#allocation8 + $0x90] sm:$0xff] }
 0x250   :  { %v1643_v36 = vpop.eup %1642  ;;  %519 = vmatpush.msra.mxu3 %v2096_v14 }
 0x251   :  { %v419_v37 = vsel %vm398_vm2, %v1643_v36, 0.0  ;;  %v414_v40 = vsub.f32 %v395_v6, %v412_v35  ;;  %v2101_v35 = vld [vmem:[#allocation8 + $0x88] sm:$0xff] }
 0x252   :  { %v420_v42 = vrot.slane %v419_v37, 4  ;;  %520 = vmatpush.msra.mxu3 %v2098_v34 }
 0x253   :  { %v417_v29 = vmul.f32 1.442695, %v414_v40  ;;  %v2111_v40 = vld [vmem:[#allocation8 + $0x70] sm:$0xff] }
 0x254   :  { %v421_v47 = vadd.f32 %v420_v42, %v419_v37  ;;  %521 = vmatpush.msra.mxu3 %v2101_v35  ;;  %v2108_v37 = vld [vmem:[#allocation8 + $0x78] sm:$0xff]  ;;  %v2114_v42 = vld [vmem:[#allocation8 + $0x68] sm:$0xff] }
 0x255   :  { %1644 = vpow2.f32 %v417_v29  ;;  %547 = vmatpush.msrb.mxu2 %v2108_v37  ;;  %v2116_v29 = vld [vmem:[#allocation8 + $0x60] sm:$0xff] }
 0x256   :  { %v422_v49 = vrot.slane %v421_v47, 2 }
 0x257   :  { %548 = vmatpush.msrb.mxu2 %v2111_v40 }
 0x258   :  { %v423_v50 = vadd.f32 %v422_v49, %v421_v47 }
 0x259   :  { %549 = vmatpush.msrb.mxu2 %v2114_v42 }
 0x25a   :  { %v424_v51 = vrot.slane %v423_v50, 1 }
 0x25b   :  { %v1645_v52 = vpop.eup %1644  ;;  %550 = vmatpush.msrb.mxu2 %v2116_v29 }
 0x25c   :  { %v426_v57 = vsel %vm398_vm2, %v1645_v52, 0.0  ;;  %v425_v58 = vadd.f32 %v424_v51, %v423_v50  ;;  %v2120_v51 = vld [vmem:[#allocation8 + $0xb8] sm:$0xff] }
 0x25d   :  { %v427_v59 = vrot.slane %v426_v57, 4 }
 0x25e   :  { %1646 = vrcp.f32 %v425_v58  ;;  %v2126_v58 = vld [vmem:[#allocation8 + $0xa8] sm:$0xff] }
 0x25f   :  { %v428_v60 = vadd.f32 %v427_v59, %v426_v57  ;;  %v2129_v59 = vld [vmem:[#allocation8 + $0xa0] sm:$0xff] }
 0x261   :  { %v429_v62 = vrot.slane %v428_v60, 2 }
 0x263   :  { %v430_v4 = vadd.f32 %v429_v62, %v428_v60 }
 0x264   :  { %v1647_v38 = vpop.eup %1646 }
 0x265   :  { %v435_v5 = vmul.f32 %v1647_v38, %v1643_v36  ;;  %v431_v9 = vrot.slane %v430_v4, 1  ;;  %v2105_v36 = vld [vmem:[#allocation8 + $0x80] sm:$0xff] }
 0x266   :  { %522 = vmatpush.msra.mxu3 %v2105_v36 }
 0x267   :  { %v437_v6 = vadd.f32 1e-08, %v435_v5  ;;  %v432_v10 = vadd.f32 %v431_v9, %v430_v4  ;;  %v2148_v9 = vperm.slane %v1986_v61, 1 }
 0x269   :  { %v439_v11 = vsel %vm398_vm2, %v437_v6, 0.0  ;;  %1648 = vrcp.f32 %v432_v10 }
 0x26a   :  { %440 = vadd.xlane.f32.xlu1 %v439_v11 }
 0x26f   :  { %v1649_v28 = vpop.eup %1648 }
 0x270   :  { %v436_v12 = vmul.f32 %v1649_v28, %v1645_v52  ;;  %v2123_v52 = vld [vmem:[#allocation8 + $0xb0] sm:$0xff] }
 0x272   :  { %v438_v13 = vadd.f32 1e-08, %v436_v12 }
 0x274   :  { %v442_v44 = vsel %vm398_vm2, %v438_v13, 0.0 }
 0x275   :  { %443 = vadd.xlane.f32.xlu2 %v442_v44 }
 0x2dd   :  { %v441_v47 = vpop.xlane.xlu1 %440 }
 0x2de   :  { %1650 = vrcp.f32 %v441_v47 }
 0x2e4   :  { %v1651_v49 = vpop.eup %1650 }
 0x2e5   :  { %v447_v50 = vmul.f32 %v1651_v49, %v437_v6 }
 0x2e7   :  { %1586 = vmatmul.msk.f32.vlgmr.msrb.gmra.mxu3 %vm449_vm3, %v447_v50 }
 0x2e8   :  { %662 = vmatpush.msrb.mxu3 %v2120_v51  ;;  %v444_v57 = vpop.xlane.xlu2 %443 }
 0x2e9   :  { %1652 = vrcp.f32 %v444_v57 }
 0x2ea   :  { %663 = vmatpush.msrb.mxu3 %v2123_v52 }
 0x2ec   :  { %664 = vmatpush.msrb.mxu3 %v2126_v58 }
 0x2ee   :  { %665 = vmatpush.msrb.mxu3 %v2129_v59 }
 0x2ef   :  { %v1653_v60 = vpop.eup %1652  ;;  %1588 = vmatmul.msk.f32.vlgmr.msra.gmra.mxu3 %vm100_vm0, %v1894_v15 }
 0x2f0   :  { %v448_v62 = vmul.f32 %v1653_v60, %v438_v13  ;;  %1596 = vmatpush.xpose.msk.msra.mxu3 %vm100_vm0, %v2069_v53 }
 0x2f2   :  { %1587 = vmatmul.msk.f32.vlgmr.msra.gmra.mxu2 %vm449_vm3, %v448_v62 }
 0x2f3   :  { %1593 = vmatpush.xpose.msk.msra.mxu2 %vm100_vm0, %v2049_v41 }
 0x2f4   :  { %1597 = vmatpush.xpose.msk.msra.mxu3 %vm100_vm0, %v2080_v56 }
 0x2f7   :  { %1594 = vmatpush.xpose.msk.msra.mxu2 %vm100_vm0, %v2054_v43 }
 0x36a   :  { %v470_v4 = vpop.f32.mrf.mxu3 }
 0x36b   :  { %529 = vst [vmem:[#allocation1] ss:$2 sm:$0xff] %v470_v4 }
 0x372   :  { %v524_v53 = vpop.f32.mrf.mxu3 }
 0x375   :  { %v493_v38 = vpop.f32.mrf.mxu2 }
 0x376   :  { %531 = vst [vmem:[#allocation1 + $0x1] ss:$2 sm:$0xff] %v493_v38 }
 0x37d   :  { %v532_v5 = vld.sshfl [vmem:[#allocation1] sm:$0xff pattern:$0x75316420] }
 0x37e   :  { %1589 = vmatmul.msk.f32.vlgmr.msrb.gmra.mxu2 %vm100_vm0, %v532_v5 }
 0x37f   :  { %900 = vmatpush.msrb.mxu2 %v2056_v45 }
 0x381   :  { %901 = vmatpush.msrb.mxu2 %v2060_v46 }
 0x401   :  { %v552_v6 = vpop.f32.mrf.mxu2 }
 0x402   :  { %v553_v56 = vadd.f32 %v552_v6, %v524_v53 }
 0x404   :  { %v556_v10 = vadd.f32 %v2148_v9, %v553_v56 }
 0x406   :  { %577 = vrot.lane.b32.xlu0 %v556_v10, %s1843_s2  ;;  %v1590_v11 = vmul.f32 -1.442695, %v556_v10 }
 0x408   :  { %1654 = vpow2.f32 %v1590_v11 }
 0x40e   :  { %593 = vrot.lane.b32.xlu0 %v1894_v15, %s1843_s2  ;;  %v1655_v28 = vpop.eup %1654 }
 0x40f   :  { %v560_v12 = vadd.f32 1.0, %v1655_v28 }
 0x411   :  { %1656 = vrcp.f32 %v560_v12  ;;  %v572_v57 = vand.u32 2147483648, %v560_v12  ;;  %vm566_vm5 = vweird.f32 %v560_v12  ;;  %v570_v60 = vand.u32 2147483647, %v560_v12 }
 0x413   :  { %v573_v4 = vor.u32 1.1754944e-38, %v572_v57  ;;  %vm571_vm7 = vcmp.eq.f32.partialorder %v570_v60, 8.507059e+37 }
 0x417   :  { %v1657_v13 = vpop.eup %1656 }
 0x418   :  { %v562_v44 = vmul.f32 %v1657_v13, %v560_v12  ;;  %vm567_vm4 = vweird.f32 %v1657_v13 }
 0x419   :  { %vm568_vm6 = vmor %vm566_vm5, %vm567_vm4 }
 0x41a   :  { %v563_v47 = vsub.f32 1.0, %v562_v44 }
 0x41c   :  { %v564_v49 = vmul.f32 %v1657_v13, %v563_v47 }
 0x41e   :  { %v565_v50 = vadd.f32 %v1657_v13, %v564_v49 }
 0x420   :  { %v569_v62 = vsel %vm568_vm6, %v1657_v13, %v565_v50 }
 0x421   :  { %v574_v15 = vsel %vm571_vm7, %v573_v4, %v569_v62  ;;  %v628_v4 = vperm.slane %v1986_v61, 2 }
 0x422   :  { %v587_v28 = vsub.f32 1.0, %v574_v15 }
 0x478   :  { %v578_v38 = vpop.permute.xlu0 %577 }
 0x479   :  { %v580_v5 = vmul.f32 %v578_v38, %v574_v15  ;;  %v634_v38 = vperm.slane %v1986_v61, 3 }
 0x47b   :  { %582 = vrot.lane.b32.xlu1 %v580_v5, %s1835_s23 }
 0x480   :  { %v594_v11 = vpop.permute.xlu0 %593 }
 0x481   :  { %v596_v12 = vmul.f32 %v594_v11, %v574_v15 }
 0x4ed   :  { %v583_v53 = vpop.permute.xlu1 %582 }
 0x4ee   :  { %v585_v6 = vadd.f32 %v583_v53, %v556_v10 }
 0x4f0   :  { %1658 = vtanh.f32 %v585_v6 }
 0x4f6   :  { %v1659_v56 = vpop.eup %1658 }
 0x4f7   :  { %589 = vrot.lane.b32.xlu2 %v1659_v56, %s1844_s3 }
 0x551   :  { %v590_v44 = vpop.permute.xlu2 %589 }
 0x552   :  { %v592_v47 = vmul.f32 %v590_v44, %v587_v28 }
 0x554   :  { %v597_v13 = vadd.f32 %v596_v12, %v592_v47 }
 0x556   :  { %599 = vrot.lane.b32.xlu2 %v597_v13, %s1844_s3 }
 0x5b0   :  { %v600_v49 = vpop.permute.xlu2 %599 }
 0x5b1   :  { %v602_v50 = vsel %vm100_vm0, %v600_v49, 0.0 }
 0x5b2   :  { %603 = vadd.xlane.f32.xlu1 %v602_v50 }
 0x625   :  { %v604_v57 = vpop.xlane.xlu1 %603 }
 0x626   :  { %v605_v10 = vmul.f32 %v604_v57, %v1898_v23 }
 0x628   :  { %v606_v60 = vsub.f32 %v597_v13, %v605_v10 }
 0x62a   :  { %v607_v62 = vmul.f32 %v606_v60, %v606_v60 }
 0x62c   :  { %609 = vrot.lane.b32.xlu0 %v607_v62, %s1844_s3 }
 0x634   :  { %630 = vrot.lane.b32.xlu0 %v628_v4, %s1843_s2 }
 0x63c   :  { %636 = vrot.lane.b32.xlu0 %v634_v38, %s1843_s2 }
 0x69e   :  { %v610_v15 = vpop.permute.xlu0 %609 }
 0x69f   :  { %v612_v5 = vsel %vm100_vm0, %v610_v15, 0.0 }
 0x6a0   :  { %613 = vadd.xlane.f32.xlu2 %v612_v5 }
 0x6a6   :  { %v2166_v12 = vpop.permute.xlu0 %630 }
 0x6ae   :  { %v2168_v62 = vpop.permute.xlu0 %636 }
 0x713   :  { %v614_v53 = vpop.xlane.xlu2 %613 }
 0x714   :  { %v615_v6 = vmul.f32 %v614_v53, %v1898_v23 }
 0x716   :  { %v616_v56 = vadd.f32 1e-05, %v615_v6 }
 0x718   :  { %1660 = vrsqrt.f32 %v616_v56  ;;  %vm623_vm9 = vweird.f32 %v616_v56 }
 0x71e   :  { %v1661_v11 = vpop.eup %1660 }
 0x71f   :  { %v618_v28 = vmul.f32 %v1661_v11, %v616_v56  ;;  %vm624_vm8 = vweird.f32 %v1661_v11  ;;  %v712_v56 = vperm.slane %v1986_v61, 5 }
 0x720   :  { %vm625_vm10 = vmor %vm623_vm9, %vm624_vm8 }
 0x721   :  { %v619_v44 = vmul.f32 %v1661_v11, %v618_v28  ;;  %714 = vrot.lane.b32.xlu1 %v712_v56, %s1843_s2 }
 0x723   :  { %v620_v47 = vmul.f32 0.5, %v619_v44 }
 0x725   :  { %v621_v49 = vsub.f32 1.5, %v620_v47 }
 0x727   :  { %v622_v50 = vmul.f32 %v1661_v11, %v621_v49 }
 0x729   :  { %v626_v57 = vsel %vm625_vm10, %v1661_v11, %v622_v50 }
 0x72a   :  { %v627_v10 = vmul.f32 %v626_v57, %v606_v60  ;;  %v2179_v60 = vperm.slane %v1986_v61, 4 }
 0x72c   :  { %v633_v4 = vmul.f32 %v2166_v12, %v627_v10 }
 0x72e   :  { %v639_v38 = vadd.f32 %v2168_v62, %v633_v4 }
 0x730   :  { %646 = vrot.lane.b32.xlu0 %v639_v38, %s1844_s3 }
 0x793   :  { %v2189_v44 = vpop.permute.xlu1 %714 }
 0x7a2   :  { %v647_v15 = vpop.permute.xlu0 %646 }
 0x7a3   :  { %1591 = vmatmul.msk.f32.vlgmr.msrb.gmra.mxu3 %vm100_vm0, %v647_v15 }
 0x7a4   :  { %979 = vmatpush.msrb.mxu3 %v2108_v37 }
 0x7a6   :  { %980 = vmatpush.msrb.mxu3 %v2111_v40 }
 0x7a8   :  { %981 = vmatpush.msrb.mxu3 %v2114_v42 }
 0x7aa   :  { %982 = vmatpush.msrb.mxu3 %v2116_v29 }
 0x826   :  { %v667_v5 = vpop.f32.mrf.mxu3 }
 0x827   :  { %v668_v53 = vadd.f32 %v667_v5, %v2179_v60 }
 0x829   :  { %v670_v6 = vmax.f32 %v668_v53, 0.0 }
 0x82b   :  { %703 = vmatmul.f32.vlgmr.msrb.gmra.mxu0 %v670_v6 }
 0x82c   :  { %1355 = vmatpush.msrb.mxu0 %v2096_v14 }
 0x82e   :  { %1356 = vmatpush.msrb.mxu0 %v2098_v34 }
 0x830   :  { %1357 = vmatpush.msrb.mxu0 %v2101_v35 }
 0x832   :  { %1358 = vmatpush.msrb.mxu0 %v2105_v36 }
 0x8a8   :  { %v704_v11 = vpop.f32.mrf.mxu0 }
 0x8a9   :  { %708 = vrot.lane.b32.xlu0 %v704_v11, %s1843_s2 }
 0x91b   :  { %v709_v28 = vpop.permute.xlu0 %708 }
 0x91c   :  { %v711_v47 = vadd.f32 %v709_v28, %v597_v13 }
 0x91e   :  { %v2192_v49 = vadd.f32 %v2189_v44, %v711_v47 }
 0x920   :  { %719 = vrot.lane.b32.xlu0 %v2192_v49, %s1844_s3 }
 0x992   :  { %v2196_v50 = vpop.permute.xlu0 %719 }
 0x993   :  { %v722_v57 = vsel %vm100_vm0, %v2196_v50, 0.0 }
 0x994   :  { %723 = vadd.xlane.f32.xlu2 %v722_v57 }
 0xa07   :  { %v724_v10 = vpop.xlane.xlu2 %723 }
 0xa08   :  { %v725_v4 = vmul.f32 %v724_v10, %v1898_v23 }
 0xa0a   :  { %v726_v38 = vsub.f32 %v2192_v49, %v725_v4 }
 0xa0c   :  { %v727_v15 = vmul.f32 %v726_v38, %v726_v38 }
 0xa0e   :  { %729 = vrot.lane.b32.xlu0 %v727_v15, %s1844_s3 }
 0xa16   :  { %749 = vrot.lane.b32.xlu0 %v308_v3, %s1843_s2 }
 0xa80   :  { %v730_v13 = vpop.permute.xlu0 %729 }
 0xa81   :  { %v732_v5 = vsel %vm100_vm0, %v730_v13, 0.0 }
 0xa82   :  { %733 = vadd.xlane.f32.xlu2 %v732_v5 }
 0xa88   :  { %v2211_v4 = vpop.permute.xlu0 %749 }
 0xa9a   :  { %754 = vrot.lane.b32.xlu2 %v310_v7, %s1843_s2 }
 0xaf5   :  { %v734_v53 = vpop.xlane.xlu2 %733 }
 0xaf6   :  { %v735_v6 = vmul.f32 %v734_v53, %v1898_v23 }
 0xaf8   :  { %v736_v56 = vadd.f32 1e-05, %v735_v6 }
 0xafa   :  { %1662 = vrsqrt.f32 %v736_v56  ;;  %vm743_vm12 = vweird.f32 %v736_v56 }
 0xafd   :  { %v2213_v61 = vpop.permute.xlu2 %754 }
 0xb00   :  { %v1663_v11 = vpop.eup %1662 }
 0xb01   :  { %v738_v28 = vmul.f32 %v1663_v11, %v736_v56  ;;  %vm744_vm11 = vweird.f32 %v1663_v11 }
 0xb02   :  { %vm745_vm13 = vmor %vm743_vm12, %vm744_vm11 }
 0xb03   :  { %v739_v47 = vmul.f32 %v1663_v11, %v738_v28 }
 0xb05   :  { %v740_v57 = vmul.f32 0.5, %v739_v47 }
 0xb07   :  { %v741_v10 = vsub.f32 1.5, %v740_v57 }
 0xb09   :  { %v742_v8 = vmul.f32 %v1663_v11, %v741_v10 }
 0xb0b   :  { %v746_v3 = vsel %vm745_vm13, %v1663_v11, %v742_v8 }
 0xb0c   :  { %v747_v15 = vmul.f32 %v746_v3, %v726_v38 }
 0xb0e   :  { %v752_v7 = vmul.f32 %v2211_v4, %v747_v15 }
 0xb10   :  { %v757_v13 = vadd.f32 %v2213_v61, %v752_v7 }
 0xb12   :  { %763 = vrot.lane.b32.xlu0 %v757_v13, %s1844_s3 }
 0xb84   :  { %v764_v5 = vpop.permute.xlu0 %763 }
 0xb85   :  { %1592 = vmatmul.msk.f32.vlgmr.msrb.gmra.mxu1 %vm100_vm0, %v764_v5 }
 0xb86   :  { %1104 = vmatpush.msrb.mxu1 %v1963_v30 }
 0xb88   :  { %1105 = vmatpush.msrb.mxu1 %v1965_v31 }
 0xb8a   :  { %1106 = vmatpush.msrb.mxu1 %v2006_v16 }
 0xb8c   :  { %1107 = vmatpush.msrb.mxu1 %v2008_v17 }
 0xb8e   :  { %1108 = vmatpush.msrb.mxu1 %v2011_v18 }
 0xb90   :  { %1109 = vmatpush.msrb.mxu1 %v2014_v39 }
 0xb92   :  { %1110 = vmatpush.msrb.mxu1 %v2018_v19 }
 0xb94   :  { %1111 = vmatpush.msrb.mxu1 %v2020_v20 }
 0xb96   :  { %1112 = vmatpush.msrb.mxu1 %v2023_v21 }
 0xb98   :  { %1113 = vmatpush.msrb.mxu1 %v2026_v22 }
 0xb9a   :  { %1114 = vmatpush.msrb.mxu1 %v2030_v24 }
 0xb9c   :  { %1115 = vmatpush.msrb.mxu1 %v2033_v25 }
 0xb9e   :  { %1116 = vmatpush.msrb.mxu1 %v2036_v26 }
 0xba0   :  { %1117 = vmatpush.msrb.mxu1 %v2039_v27 }
 0xba2   :  { %1118 = vmatpush.msrb.mxu1 %v2042_v32 }
 0xba4   :  { %1119 = vmatpush.msrb.mxu1 %v2044_v33 }
 0xc02   :  { %v784_v30 = vpop.f32.mrf.mxu1 }
 0xc03   :  { %v785_v31 = vadd.f32 %v784_v30, %v2064_v48 }
 0xc05   :  { %v788_v16 = vrot.slane %v785_v31, 4  ;;  %1595 = vmatmul.msk.f32.vlgmr.msra.gmra.mxu2 %vm100_vm0, %v785_v31 }
 0xc06   :  { %951 = vmatpush.msra.mxu2 %v2096_v14 }
 0xc07   :  { %1598 = vmatmul.msk.f32.vlgmr.msra.gmra.mxu3 %vm100_vm0, %v788_v16 }
 0xc08   :  { %952 = vmatpush.msra.mxu2 %v2098_v34  ;;  %1079 = vmatpush.msra.mxu3 %v2120_v51 }
 0xc0a   :  { %953 = vmatpush.msra.mxu2 %v2101_v35  ;;  %1080 = vmatpush.msra.mxu3 %v2123_v52 }
 0xc0c   :  { %954 = vmatpush.msra.mxu2 %v2105_v36  ;;  %1081 = vmatpush.msra.mxu3 %v2126_v58 }
 0xc0e   :  { %1082 = vmatpush.msra.mxu3 %v2129_v59 }
 0xc88   :  { %v808_v17 = vpop.f32.mrf.mxu2 }
 0xc89   :  { %v833_v18 = vsel %vm398_vm2, %v808_v17, -inf }
 0xc8a   :  { %v834_v39 = vrot.slane %v833_v18, 4  ;;  %v830_v19 = vpop.f32.mrf.mxu3 }
 0xc8b   :  { %v840_v20 = vsel %vm398_vm2, %v830_v19, -inf }
 0xc8c   :  { %v835_v21 = vmax.f32 %v833_v18, %v834_v39  ;;  %v841_v22 = vrot.slane %v840_v20, 4 }
 0xc8e   :  { %v836_v24 = vrot.slane %v835_v21, 2  ;;  %v842_v25 = vmax.f32 %v840_v20, %v841_v22 }
 0xc90   :  { %v837_v26 = vmax.f32 %v835_v21, %v836_v24  ;;  %v843_v27 = vrot.slane %v842_v25, 2 }
 0xc92   :  { %v838_v32 = vrot.slane %v837_v26, 1  ;;  %v844_v33 = vmax.f32 %v842_v25, %v843_v27 }
 0xc94   :  { %v839_v14 = vmax.f32 %v837_v26, %v838_v32  ;;  %v845_v34 = vrot.slane %v844_v33, 1 }
 0xc96   :  { %v847_v35 = vsub.f32 %v808_v17, %v839_v14  ;;  %v846_v36 = vmax.f32 %v844_v33, %v845_v34 }
 0xc98   :  { %v849_v51 = vmul.f32 1.442695, %v847_v35  ;;  %v848_v52 = vsub.f32 %v830_v19, %v846_v36 }
 0xc9a   :  { %1664 = vpow2.f32 %v849_v51  ;;  %v851_v58 = vmul.f32 1.442695, %v848_v52 }
 0xc9c   :  { %1666 = vpow2.f32 %v851_v58 }
 0xca0   :  { %v1665_v59 = vpop.eup %1664 }
 0xca1   :  { %v853_v38 = vsel %vm398_vm2, %v1665_v59, 0.0 }
 0xca2   :  { %v1667_v53 = vpop.eup %1666  ;;  %v854_v6 = vrot.slane %v853_v38, 4 }
 0xca3   :  { %v860_v56 = vsel %vm398_vm2, %v1667_v53, 0.0 }
 0xca4   :  { %v855_v11 = vadd.f32 %v854_v6, %v853_v38  ;;  %v861_v28 = vrot.slane %v860_v56, 4 }
 0xca6   :  { %v856_v47 = vrot.slane %v855_v11, 2  ;;  %v862_v57 = vadd.f32 %v861_v28, %v860_v56 }
 0xca8   :  { %v863_v10 = vrot.slane %v862_v57, 2  ;;  %v857_v8 = vadd.f32 %v856_v47, %v855_v11 }
 0xcaa   :  { %v858_v3 = vrot.slane %v857_v8, 1  ;;  %v864_v15 = vadd.f32 %v863_v10, %v862_v57 }
 0xcac   :  { %v859_v7 = vadd.f32 %v858_v3, %v857_v8  ;;  %v865_v13 = vrot.slane %v864_v15, 1 }
 0xcae   :  { %1668 = vrcp.f32 %v859_v7  ;;  %v866_v5 = vadd.f32 %v865_v13, %v864_v15 }
 0xcb0   :  { %1670 = vrcp.f32 %v866_v5 }
 0xcb4   :  { %v1669_v30 = vpop.eup %1668 }
 0xcb5   :  { %v869_v31 = vmul.f32 %v1669_v30, %v1665_v59 }
 0xcb6   :  { %v1671_v16 = vpop.eup %1670 }
 0xcb7   :  { %v871_v17 = vadd.f32 1e-08, %v869_v31  ;;  %v870_v18 = vmul.f32 %v1671_v16, %v1667_v53 }
 0xcb9   :  { %v873_v39 = vsel %vm398_vm2, %v871_v17, 0.0  ;;  %v872_v19 = vadd.f32 1e-08, %v870_v18 }
 0xcba   :  { %874 = vadd.xlane.f32.xlu1 %v873_v39 }
 0xcbb   :  { %v876_v20 = vsel %vm398_vm2, %v872_v19, 0.0 }
 0xcbc   :  { %877 = vadd.xlane.f32.xlu0 %v876_v20 }
 0xd2d   :  { %v875_v21 = vpop.xlane.xlu1 %874 }
 0xd2e   :  { %1672 = vrcp.f32 %v875_v21 }
 0xd2f   :  { %v878_v22 = vpop.xlane.xlu0 %877 }
 0xd30   :  { %1674 = vrcp.f32 %v878_v22 }
 0xd34   :  { %v1673_v24 = vpop.eup %1672 }
 0xd35   :  { %v881_v25 = vmul.f32 %v1673_v24, %v871_v17 }
 0xd36   :  { %v1675_v26 = vpop.eup %1674 }
 0xd37   :  { %v882_v27 = vmul.f32 %v1675_v26, %v872_v19  ;;  %1599 = vmatmul.msk.f32.vlgmr.msrb.gmra.mxu2 %vm449_vm3, %v881_v25 }
 0xd38   :  { %1183 = vmatpush.msrb.mxu2 %v1935_v63 }
 0xd39   :  { %1600 = vmatmul.msk.f32.vlgmr.msra.gmra.mxu1 %vm449_vm3, %v882_v27 }
 0xd3a   :  { %1184 = vmatpush.msrb.mxu2 %v1939_v0 }
 0xd3c   :  { %1185 = vmatpush.msrb.mxu2 %v1943_v1 }
 0xd3e   :  { %1186 = vmatpush.msrb.mxu2 %v1946_v2 }
 0xd3f   :  { %1601 = vmatmul.msk.f32.vlgmr.msra.gmra.mxu2 %vm100_vm0, %v2196_v50 }
 0xd40   :  { %1304 = vmatpush.msra.mxu2 %v2056_v45 }
 0xd42   :  { %1305 = vmatpush.msra.mxu2 %v2060_v46 }
 0xdb6   :  { %v926_v32 = vpop.f32.mrf.mxu1 }
 0xdb7   :  { %963 = vst [vmem:[#allocation1 + $0x1] ss:$2 sm:$0xff] %v926_v32 }
 0xdba   :  { %v903_v33 = vpop.f32.mrf.mxu2 }
 0xdbb   :  { %961 = vst [vmem:[#allocation1] ss:$2 sm:$0xff] %v903_v33 }
 0xdc2   :  { %v964_v63 = vld.sshfl [vmem:[#allocation1] sm:$0xff pattern:$0x75316420]  ;;  %v956_v0 = vpop.f32.mrf.mxu2 }
 0xdc3   :  { %1602 = vmatmul.msk.f32.vlgmr.msrb.gmra.mxu3 %vm100_vm0, %v964_v63 }
 0xdc4   :  { %1606 = vmatpush.xpose.msk.msrb.mxu3 %vm100_vm0, %v2049_v41 }
 0xdc8   :  { %1607 = vmatpush.xpose.msk.msrb.mxu3 %vm100_vm0, %v2054_v43 }
 0xe46   :  { %v984_v1 = vpop.f32.mrf.mxu3 }
 0xe47   :  { %v985_v2 = vadd.f32 %v984_v1, %v956_v0 }
 0xe49   :  { %v987_v45 = vadd.f32 %v985_v2, %v2148_v9 }
 0xe4b   :  { %1008 = vrot.lane.b32.xlu2 %v987_v45, %s1843_s2  ;;  %v1603_v46 = vmul.f32 -1.442695, %v987_v45 }
 0xe4d   :  { %1676 = vpow2.f32 %v1603_v46 }
 0xe53   :  { %v1677_v50 = vpop.eup %1676 }
 0xe54   :  { %v991_v14 = vadd.f32 1.0, %v1677_v50 }
 0xe56   :  { %1678 = vrcp.f32 %v991_v14  ;;  %v1003_v52 = vand.u32 2147483648, %v991_v14  ;;  %vm997_vm15 = vweird.f32 %v991_v14  ;;  %v1001_v43 = vand.u32 2147483647, %v991_v14 }
 0xe58   :  { %v1004_v59 = vor.u32 1.1754944e-38, %v1003_v52  ;;  %vm1002_vm4 = vcmp.eq.f32.partialorder %v1001_v43, 8.507059e+37 }
 0xe5c   :  { %v1679_v34 = vpop.eup %1678 }
 0xe5d   :  { %v993_v35 = vmul.f32 %v1679_v34, %v991_v14  ;;  %vm998_vm14 = vweird.f32 %v1679_v34 }
 0xe5e   :  { %vm999_vm1 = vmor %vm997_vm15, %vm998_vm14 }
 0xe5f   :  { %v994_v36 = vsub.f32 1.0, %v993_v35 }
 0xe61   :  { %v995_v51 = vmul.f32 %v1679_v34, %v994_v36 }
 0xe63   :  { %v996_v41 = vadd.f32 %v1679_v34, %v995_v51 }
 0xe65   :  { %v1000_v58 = vsel %vm999_vm1, %v1679_v34, %v996_v41 }
 0xe66   :  { %v1005_v53 = vsel %vm1002_vm4, %v1004_v59, %v1000_v58 }
 0xe67   :  { %v1018_v47 = vsub.f32 1.0, %v1005_v53  ;;  %v1024_v10 = vmul.f32 %v1005_v53, %v2192_v49 }
 0xea5   :  { %v1009_v38 = vpop.permute.xlu2 %1008 }
 0xea6   :  { %v1011_v6 = vmul.f32 %v1009_v38, %v1005_v53 }
 0xea8   :  { %1013 = vrot.lane.b32.xlu2 %v1011_v6, %s1835_s23 }
 0xf02   :  { %v1014_v56 = vpop.permute.xlu2 %1013 }
 0xf03   :  { %v1016_v11 = vadd.f32 %v1014_v56, %v987_v45 }
 0xf05   :  { %1680 = vtanh.f32 %v1016_v11 }
 0xf0b   :  { %v1681_v28 = vpop.eup %1680 }
 0xf0c   :  { %1020 = vrot.lane.b32.xlu2 %v1681_v28, %s1844_s3 }
 0xf66   :  { %v1021_v57 = vpop.permute.xlu2 %1020 }
 0xf67   :  { %v1023_v8 = vmul.f32 %v1021_v57, %v1018_v47 }
 0xf69   :  { %v1025_v3 = vadd.f32 %v1024_v10, %v1023_v8 }
 0xf6b   :  { %1027 = vrot.lane.b32.xlu1 %v1025_v3, %s1844_s3 }
 0xfdd   :  { %v1028_v15 = vpop.permute.xlu1 %1027 }
 0xfde   :  { %v1030_v7 = vsel %vm100_vm0, %v1028_v15, 0.0 }
 0xfdf   :  { %1031 = vadd.xlane.f32.xlu2 %v1030_v7 }
0x1052   :  { %v1032_v13 = vpop.xlane.xlu2 %1031 }
0x1053   :  { %v1033_v5 = vmul.f32 %v1032_v13, %v1898_v23 }
0x1055   :  { %v1034_v30 = vsub.f32 %v1025_v3, %v1033_v5 }
0x1057   :  { %v1035_v31 = vmul.f32 %v1034_v30, %v1034_v30 }
0x1059   :  { %1037 = vrot.lane.b32.xlu0 %v1035_v31, %s1844_s3 }
0x10cb   :  { %v1038_v16 = vpop.permute.xlu0 %1037 }
0x10cc   :  { %v1040_v17 = vsel %vm100_vm0, %v1038_v16, 0.0 }
0x10cd   :  { %1041 = vadd.xlane.f32.xlu1 %v1040_v17 }
0x1140   :  { %v1042_v49 = vpop.xlane.xlu1 %1041 }
0x1141   :  { %v1043_v18 = vmul.f32 %v1042_v49, %v1898_v23 }
0x1143   :  { %v1044_v39 = vadd.f32 1e-05, %v1043_v18 }
0x1145   :  { %1682 = vrsqrt.f32 %v1044_v39  ;;  %vm1051_vm6 = vweird.f32 %v1044_v39 }
0x114b   :  { %v1683_v19 = vpop.eup %1682 }
0x114c   :  { %v1046_v20 = vmul.f32 %v1683_v19, %v1044_v39  ;;  %vm1052_vm5 = vweird.f32 %v1683_v19 }
0x114d   :  { %vm1053_vm7 = vmor %vm1051_vm6, %vm1052_vm5 }
0x114e   :  { %v1047_v21 = vmul.f32 %v1683_v19, %v1046_v20 }
0x1150   :  { %v1048_v22 = vmul.f32 0.5, %v1047_v21 }
0x1152   :  { %v1049_v24 = vsub.f32 1.5, %v1048_v22 }
0x1154   :  { %v1050_v25 = vmul.f32 %v1683_v19, %v1049_v24 }
0x1156   :  { %v1054_v26 = vsel %vm1053_vm7, %v1683_v19, %v1050_v25 }
0x1157   :  { %v1055_v27 = vmul.f32 %v1054_v26, %v1034_v30 }
0x1159   :  { %v1056_v32 = vmul.f32 %v1055_v27, %v2166_v12 }
0x115b   :  { %v1057_v33 = vadd.f32 %v1056_v32, %v2168_v62 }
0x115d   :  { %1063 = vrot.lane.b32.xlu0 %v1057_v33, %s1844_s3 }
0x11cf   :  { %v1064_v63 = vpop.permute.xlu0 %1063 }
0x11d0   :  { %1604 = vmatmul.msk.f32.vlgmr.msra.gmra.mxu3 %vm100_vm0, %v1064_v63 }
0x11d1   :  { %1327 = vmatpush.msra.mxu3 %v2071_v54 }
0x11d3   :  { %1328 = vmatpush.msra.mxu3 %v2073_v55 }
0x1253   :  { %v1084_v0 = vpop.f32.mrf.mxu3 }
0x1254   :  { %v1085_v1 = vadd.f32 %v1084_v0, %v2179_v60 }
0x1256   :  { %v1087_v2 = vmax.f32 %v1085_v1, 0.0 }
0x1258   :  { %1120 = vmatmul.f32.vlgmr.msrb.gmra.mxu1 %v1087_v2 }
0x12d5   :  { %v1121_v45 = vpop.f32.mrf.mxu1 }
0x12d6   :  { %1125 = vrot.lane.b32.xlu0 %v1121_v45, %s1843_s2 }
0x1348   :  { %v1126_v46 = vpop.permute.xlu0 %1125 }
0x1349   :  { %v1128_v50 = vadd.f32 %v1126_v46, %v1025_v3 }
0x134b   :  { %v2287_v14 = vadd.f32 %v1128_v50, %v2189_v44 }
0x134d   :  { %1131 = vrot.lane.b32.xlu0 %v2287_v14, %s1844_s3 }
0x13bf   :  { %v1132_v34 = vpop.permute.xlu0 %1131 }
0x13c0   :  { %v1134_v54 = vsel %vm100_vm0, %v1132_v34, 0.0 }
0x13c1   :  { %1135 = vadd.xlane.f32.xlu2 %v1134_v54 }
0x1434   :  { %v1136_v55 = vpop.xlane.xlu2 %1135 }
0x1435   :  { %v1137_v35 = vmul.f32 %v1136_v55, %v1898_v23 }
0x1437   :  { %v1138_v36 = vsub.f32 %v2287_v14, %v1137_v35 }
0x1439   :  { %v1139_v51 = vmul.f32 %v1138_v36, %v1138_v36 }
0x143b   :  { %1141 = vrot.lane.b32.xlu0 %v1139_v51, %s1844_s3 }
0x14ad   :  { %v1142_v41 = vpop.permute.xlu0 %1141 }
0x14ae   :  { %v1144_v52 = vsel %vm100_vm0, %v1142_v41, 0.0 }
0x14af   :  { %1145 = vadd.xlane.f32.xlu2 %v1144_v52 }
0x1522   :  { %v1146_v43 = vpop.xlane.xlu2 %1145 }
0x1523   :  { %v1147_v58 = vmul.f32 %v1146_v43, %v1898_v23 }
0x1525   :  { %v1148_v59 = vadd.f32 1e-05, %v1147_v58 }
0x1527   :  { %1684 = vrsqrt.f32 %v1148_v59  ;;  %vm1155_vm9 = vweird.f32 %v1148_v59 }
0x152d   :  { %v1685_v38 = vpop.eup %1684 }
0x152e   :  { %v1150_v53 = vmul.f32 %v1685_v38, %v1148_v59  ;;  %vm1156_vm8 = vweird.f32 %v1685_v38 }
0x152f   :  { %vm1157_vm10 = vmor %vm1155_vm9, %vm1156_vm8 }
0x1530   :  { %v1151_v6 = vmul.f32 %v1685_v38, %v1150_v53 }
0x1532   :  { %v1152_v56 = vmul.f32 0.5, %v1151_v6 }
0x1534   :  { %v1153_v11 = vsub.f32 1.5, %v1152_v56 }
0x1536   :  { %v1154_v28 = vmul.f32 %v1685_v38, %v1153_v11 }
0x1538   :  { %v1158_v47 = vsel %vm1157_vm10, %v1685_v38, %v1154_v28 }
0x1539   :  { %v1159_v57 = vmul.f32 %v1158_v47, %v1138_v36 }
0x153b   :  { %v1160_v10 = vmul.f32 %v1159_v57, %v2211_v4 }
0x153d   :  { %v1161_v8 = vadd.f32 %v1160_v10, %v2213_v61 }
0x153f   :  { %1167 = vrot.lane.b32.xlu0 %v1161_v8, %s1844_s3 }
0x15b1   :  { %v1168_v3 = vpop.permute.xlu0 %1167 }
0x15b2   :  { %1605 = vmatmul.msk.f32.vlgmr.msrb.gmra.mxu2 %vm100_vm0, %v1168_v3 }
0x15b3   :  { %1383 = vmatpush.msrb.mxu2 %v2108_v37 }
0x15b5   :  { %1384 = vmatpush.msrb.mxu2 %v2111_v40 }
0x15b7   :  { %1385 = vmatpush.msrb.mxu2 %v2114_v42 }
0x15b9   :  { %1386 = vmatpush.msrb.mxu2 %v2116_v29 }
0x1635   :  { %v1188_v15 = vpop.f32.mrf.mxu2 }
0x1636   :  { %v1189_v7 = vadd.f32 %v1188_v15, %v2064_v48 }
0x1638   :  { %v1192_v13 = vrot.slane %v1189_v7, 4  ;;  %1608 = vmatmul.msk.f32.vlgmr.msrb.gmra.mxu3 %vm100_vm0, %v1189_v7 }
0x163a   :  { %1611 = vmatmul.msk.f32.vlgmr.msra.gmra.mxu0 %vm100_vm0, %v1192_v13 }
0x1642   :  { %1614 = vmatmul.msk.f32.vlgmr.msrb.gmra.mxu0 %vm100_vm0, %v1132_v34 }
0x16b7   :  { %v1234_v4 = vpop.f32.mrf.mxu0 }
0x16b8   :  { %v1244_v61 = vsel %vm398_vm2, %v1234_v4, -inf }
0x16b9   :  { %v1245_v37 = vrot.slane %v1244_v61, 4 }
0x16bb   :  { %v1246_v5 = vmax.f32 %v1244_v61, %v1245_v37  ;;  %v1212_v40 = vpop.f32.mrf.mxu3 }
0x16bc   :  { %v1237_v42 = vsel %vm398_vm2, %v1212_v40, -inf }
0x16bd   :  { %v1247_v30 = vrot.slane %v1246_v5, 2  ;;  %v1238_v29 = vrot.slane %v1237_v42, 4 }
0x16bf   :  { %v1248_v31 = vmax.f32 %v1246_v5, %v1247_v30  ;;  %v1239_v16 = vmax.f32 %v1237_v42, %v1238_v29  ;;  %v1360_v3 = vpop.f32.mrf.mxu0 }
0x16c1   :  { %v1249_v48 = vrot.slane %v1248_v31, 1  ;;  %v1240_v17 = vrot.slane %v1239_v16, 2 }
0x16c3   :  { %v1250_v49 = vmax.f32 %v1248_v31, %v1249_v48  ;;  %v1241_v18 = vmax.f32 %v1239_v16, %v1240_v17 }
0x16c5   :  { %v1252_v39 = vsub.f32 %v1234_v4, %v1250_v49  ;;  %v1242_v19 = vrot.slane %v1241_v18, 1 }
0x16c7   :  { %v1255_v20 = vmul.f32 1.442695, %v1252_v39  ;;  %v1243_v21 = vmax.f32 %v1241_v18, %v1242_v19 }
0x16c9   :  { %1686 = vpow2.f32 %v1255_v20  ;;  %v1251_v22 = vsub.f32 %v1212_v40, %v1243_v21 }
0x16cb   :  { %v1253_v24 = vmul.f32 1.442695, %v1251_v22 }
0x16cd   :  { %1688 = vpow2.f32 %v1253_v24 }
0x16cf   :  { %v1687_v25 = vpop.eup %1686 }
0x16d0   :  { %v1264_v26 = vsel %vm398_vm2, %v1687_v25, 0.0 }
0x16d1   :  { %v1265_v27 = vrot.slane %v1264_v26, 4 }
0x16d3   :  { %v1689_v32 = vpop.eup %1688  ;;  %v1266_v33 = vadd.f32 %v1265_v27, %v1264_v26 }
0x16d4   :  { %v1257_v63 = vsel %vm398_vm2, %v1689_v32, 0.0 }
0x16d5   :  { %v1267_v0 = vrot.slane %v1266_v33, 2  ;;  %v1258_v1 = vrot.slane %v1257_v63, 4 }
0x16d7   :  { %v1259_v2 = vadd.f32 %v1258_v1, %v1257_v63  ;;  %v1268_v45 = vadd.f32 %v1267_v0, %v1266_v33 }
0x16d9   :  { %v1260_v46 = vrot.slane %v1259_v2, 2  ;;  %v1269_v50 = vrot.slane %v1268_v45, 1 }
0x16db   :  { %v1270_v34 = vadd.f32 %v1269_v50, %v1268_v45  ;;  %v1261_v54 = vadd.f32 %v1260_v46, %v1259_v2  ;;  %v1465_v45 = vld [vmem:[#allocation8 + $0xb8] sm:$0xff]  ;;  %v1464_v46 = vld [vmem:[#allocation8 + $0xb0] sm:$0xff]  ;;  %v1463_v50 = vld [vmem:[#allocation8 + $0xa8] sm:$0xff] }
0x16dc   :  { %1483 = vmatpush.msrb.mxu3 %v1465_v45 }
0x16dd   :  { %1690 = vrcp.f32 %v1270_v34  ;;  %v1262_v55 = vrot.slane %v1261_v54, 1 }
0x16de   :  { %1484 = vmatpush.msrb.mxu3 %v1464_v46 }
0x16df   :  { %v1263_v35 = vadd.f32 %v1262_v55, %v1261_v54  ;;  %v1462_v55 = vld [vmem:[#allocation8 + $0xa0] sm:$0xff] }
0x16e0   :  { %1485 = vmatpush.msrb.mxu3 %v1463_v50 }
0x16e1   :  { %1692 = vrcp.f32 %v1263_v35 }
0x16e2   :  { %1486 = vmatpush.msrb.mxu3 %v1462_v55 }
0x16e3   :  { %v1691_v36 = vpop.eup %1690 }
0x16e4   :  { %v1274_v51 = vmul.f32 %v1691_v36, %v1687_v25 }
0x16e6   :  { %v1276_v41 = vadd.f32 1e-08, %v1274_v51 }
0x16e7   :  { %v1693_v52 = vpop.eup %1692 }
0x16e8   :  { %v1280_v43 = vsel %vm398_vm2, %v1276_v41, 0.0  ;;  %v1273_v58 = vmul.f32 %v1693_v52, %v1689_v32 }
0x16e9   :  { %1281 = vadd.xlane.f32.xlu1 %v1280_v43 }
0x16ea   :  { %v1275_v59 = vadd.f32 1e-08, %v1273_v58 }
0x16ec   :  { %v1277_v38 = vsel %vm398_vm2, %v1275_v59, 0.0 }
0x16ed   :  { %1278 = vadd.xlane.f32.xlu2 %v1277_v38 }
0x175c   :  { %v1282_v53 = vpop.xlane.xlu1 %1281 }
0x175d   :  { %1694 = vrcp.f32 %v1282_v53 }
0x1760   :  { %v1279_v6 = vpop.xlane.xlu2 %1278 }
0x1761   :  { %1696 = vrcp.f32 %v1279_v6  ;;  %v1507_v6 = vld [vmem:[#allocation8 + $0x138] sm:$0xff] }
0x1762   :  { %1508 = vmatpush.msra.mxu0 %v1507_v6 }
0x1763   :  { %v1695_v56 = vpop.eup %1694 }
0x1764   :  { %v1286_v11 = vmul.f32 %v1695_v56, %v1276_v41  ;;  %v1506_v56 = vld [vmem:[#allocation8 + $0x130] sm:$0xff] }
0x1765   :  { %1509 = vmatpush.msra.mxu0 %v1506_v56 }
0x1766   :  { %1613 = vmatmul.msk.f32.vlgmr.msra.gmra.mxu3 %vm449_vm3, %v1286_v11  ;;  %v1505_v11 = vld [vmem:[#allocation8 + $0x128] sm:$0xff] }
0x1767   :  { %v1697_v28 = vpop.eup %1696  ;;  %1510 = vmatpush.msra.mxu0 %v1505_v11 }
0x1768   :  { %v1285_v47 = vmul.f32 %v1697_v28, %v1275_v59  ;;  %v1504_v28 = vld [vmem:[#allocation8 + $0x120] sm:$0xff] }
0x1769   :  { %1511 = vmatpush.msra.mxu0 %v1504_v28 }
0x176a   :  { %1612 = vmatmul.msk.f32.vlgmr.msra.gmra.mxu2 %vm449_vm3, %v1285_v47  ;;  %v1503_v47 = vld [vmem:[#allocation8 + $0x118] sm:$0xff] }
0x176b   :  { %1512 = vmatpush.msra.mxu0 %v1503_v47 }
0x17e9   :  { %v1330_v57 = vpop.f32.mrf.mxu3 }
0x17ea   :  { %1367 = vst [vmem:[#allocation1 + $0x1] ss:$2 sm:$0xff] %v1330_v57  ;;  %v1502_v57 = vld [vmem:[#allocation8 + $0x110] sm:$0xff] }
0x17eb   :  { %1513 = vmatpush.msra.mxu0 %v1502_v57 }
0x17ed   :  { %v1307_v10 = vpop.f32.mrf.mxu2 }
0x17ee   :  { %1365 = vst [vmem:[#allocation1] ss:$2 sm:$0xff] %v1307_v10  ;;  %v1501_v10 = vld [vmem:[#allocation8 + $0x108] sm:$0xff] }
0x17ef   :  { %1514 = vmatpush.msra.mxu0 %v1501_v10 }
0x17f5   :  { %v1368_v8 = vld.sshfl [vmem:[#allocation1] sm:$0xff pattern:$0x75316420] }
0x17f6   :  { %1615 = vmatmul.msk.f32.vlgmr.msrb.gmra.mxu2 %vm100_vm0, %v1368_v8  ;;  %v1500_v8 = vld [vmem:[#allocation8 + $0x100] sm:$0xff] }
0x17f7   :  { %1515 = vmatpush.msra.mxu0 %v1500_v8 }
0x1879   :  { %v1388_v15 = vpop.f32.mrf.mxu2 }
0x187a   :  { %v1389_v7 = vadd.f32 %v1388_v15, %v1360_v3  ;;  %v1497_v3 = vld [vmem:[#allocation8 + $0xe8] sm:$0xff]  ;;  %v1496_v15 = vld [vmem:[#allocation8 + $0xe0] sm:$0xff] }
0x187c   :  { %v1391_v13 = vadd.f32 %v1389_v7, %v2148_v9  ;;  %v1495_v7 = vld [vmem:[#allocation8 + $0xd8] sm:$0xff] }
0x187e   :  { %1412 = vrot.lane.b32.xlu0 %v1391_v13, %s1843_s2  ;;  %v1616_v4 = vmul.f32 -1.442695, %v1391_v13 }
0x1880   :  { %1698 = vpow2.f32 %v1616_v4  ;;  %v1494_v4 = vld [vmem:[#allocation8 + $0xd0] sm:$0xff] }
0x1886   :  { %v1699_v61 = vpop.eup %1698 }
0x1887   :  { %v1395_v37 = vadd.f32 1.0, %v1699_v61  ;;  %v1493_v61 = vld [vmem:[#allocation8 + $0xc8] sm:$0xff] }
0x1889   :  { %1700 = vrcp.f32 %v1395_v37  ;;  %v1407_v31 = vand.u32 2147483648, %v1395_v37  ;;  %vm1401_vm3 = vweird.f32 %v1395_v37  ;;  %v1405_v16 = vand.u32 2147483647, %v1395_v37 }
0x188b   :  { %v1408_v17 = vor.u32 1.1754944e-38, %v1407_v31  ;;  %vm1406_vm12 = vcmp.eq.f32.partialorder %v1405_v16, 8.507059e+37 }
0x188f   :  { %v1701_v5 = vpop.eup %1700 }
0x1890   :  { %v1397_v40 = vmul.f32 %v1701_v5, %v1395_v37  ;;  %vm1402_vm2 = vweird.f32 %v1701_v5  ;;  %v1492_v37 = vld [vmem:[#allocation8 + $0xc0] sm:$0xff] }
0x1891   :  { %vm1403_vm11 = vmor %vm1401_vm3, %vm1402_vm2 }
0x1892   :  { %v1398_v42 = vsub.f32 1.0, %v1397_v40 }
0x1894   :  { %v1399_v30 = vmul.f32 %v1701_v5, %v1398_v42 }
0x1896   :  { %v1400_v29 = vadd.f32 %v1701_v5, %v1399_v30 }
0x1898   :  { %v1404_v48 = vsel %vm1403_vm11, %v1701_v5, %v1400_v29 }
0x1899   :  { %v1409_v49 = vsel %vm1406_vm12, %v1408_v17, %v1404_v48 }
0x189a   :  { %v1422_v21 = vsub.f32 1.0, %v1409_v49  ;;  %v1428_v24 = vmul.f32 %v1409_v49, %v2287_v14 }
0x18f0   :  { %v1413_v9 = vpop.permute.xlu0 %1412 }
0x18f1   :  { %v1415_v18 = vmul.f32 %v1413_v9, %v1409_v49 }
0x18f3   :  { %1417 = vrot.lane.b32.xlu2 %v1415_v18, %s1835_s23 }
0x194d   :  { %v1418_v39 = vpop.permute.xlu2 %1417 }
0x194e   :  { %v1420_v19 = vadd.f32 %v1418_v39, %v1391_v13 }
0x1950   :  { %1702 = vtanh.f32 %v1420_v19 }
0x1956   :  { %v1703_v20 = vpop.eup %1702 }
0x1957   :  { %1424 = vrot.lane.b32.xlu1 %v1703_v20, %s1844_s3 }
0x19c9   :  { %v1425_v22 = vpop.permute.xlu1 %1424 }
0x19ca   :  { %v1427_v25 = vmul.f32 %v1425_v22, %v1422_v21 }
0x19cc   :  { %v2323_v26 = vadd.f32 %v1428_v24, %v1427_v25 }
0x19ce   :  { %1431 = vrot.lane.b32.xlu0 %v2323_v26, %s1844_s3 }
0x1a40   :  { %v1432_v27 = vpop.permute.xlu0 %1431 }
0x1a41   :  { %v1434_v32 = vsel %vm100_vm0, %v1432_v27, 0.0 }
0x1a42   :  { %1435 = vadd.xlane.f32.xlu0 %v1434_v32 }
0x1ab5   :  { %v1436_v33 = vpop.xlane.xlu0 %1435 }
0x1ab6   :  { %v1437_v63 = vmul.f32 %v1436_v33, %v1898_v23 }
0x1ab8   :  { %v1438_v0 = vsub.f32 %v2323_v26, %v1437_v63 }
0x1aba   :  { %v1439_v1 = vmul.f32 %v1438_v0, %v1438_v0 }
0x1abc   :  { %1441 = vrot.lane.b32.xlu2 %v1439_v1, %s1844_s3 }
0x1b16   :  { %v1442_v2 = vpop.permute.xlu2 %1441 }
0x1b17   :  { %v1444_v14 = vsel %vm100_vm0, %v1442_v2, 0.0 }
0x1b18   :  { %1445 = vadd.xlane.f32.xlu1 %v1444_v14 }
0x1b8b   :  { %v1446_v34 = vpop.xlane.xlu1 %1445 }
0x1b8c   :  { %v1447_v54 = vmul.f32 %v1446_v34, %v1898_v23 }
0x1b8e   :  { %v1448_v35 = vadd.f32 1e-05, %v1447_v54 }
0x1b90   :  { %1704 = vrsqrt.f32 %v1448_v35  ;;  %vm1455_vm14 = vweird.f32 %v1448_v35 }
0x1b96   :  { %v1705_v36 = vpop.eup %1704 }
0x1b97   :  { %v1450_v51 = vmul.f32 %v1705_v36, %v1448_v35  ;;  %vm1456_vm13 = vweird.f32 %v1705_v36 }
0x1b98   :  { %vm1457_vm15 = vmor %vm1455_vm14, %vm1456_vm13 }
0x1b99   :  { %v1451_v41 = vmul.f32 %v1705_v36, %v1450_v51 }
0x1b9b   :  { %v1452_v52 = vmul.f32 0.5, %v1451_v41 }
0x1b9d   :  { %v1453_v43 = vsub.f32 1.5, %v1452_v52 }
0x1b9f   :  { %v1454_v58 = vmul.f32 %v1705_v36, %v1453_v43 }
0x1ba1   :  { %v1458_v59 = vsel %vm1457_vm15, %v1705_v36, %v1454_v58 }
0x1ba2   :  { %v1459_v38 = vmul.f32 %v1458_v59, %v1438_v0 }
0x1ba4   :  { %v1460_v53 = vmul.f32 %v1459_v38, %v2166_v12  ;;  %v1499_v12 = vld [vmem:[#allocation8 + $0xf8] sm:$0xff] }
0x1ba5   :  { %1516 = vmatpush.msra.mxu0 %v1499_v12 }
0x1ba6   :  { %v1461_v23 = vadd.f32 %v1460_v53, %v2168_v62  ;;  %v1498_v62 = vld [vmem:[#allocation8 + $0xf0] sm:$0xff] }
0x1ba7   :  { %1517 = vmatpush.msra.mxu0 %v1498_v62 }
0x1ba8   :  { %1467 = vrot.lane.b32.xlu2 %v1461_v23, %s1844_s3 }
0x1ba9   :  { %1518 = vmatpush.msra.mxu0 %v1497_v3 }
0x1bab   :  { %1519 = vmatpush.msra.mxu0 %v1496_v15 }
0x1bad   :  { %1520 = vmatpush.msra.mxu0 %v1495_v7 }
0x1baf   :  { %1521 = vmatpush.msra.mxu0 %v1494_v4 }
0x1bb1   :  { %1522 = vmatpush.msra.mxu0 %v1493_v61 }
0x1bb3   :  { %1523 = vmatpush.msra.mxu0 %v1492_v37 }
0x1c02   :  { %v1468_v13 = vpop.permute.xlu2 %1467 }
0x1c03   :  { %1617 = vmatmul.msk.f32.vlgmr.msrb.gmra.mxu3 %vm100_vm0, %v1468_v13  ;;  %vm1547_vm0 = vcmask 257024  }
0x1c86   :  { %v1488_v5 = vpop.f32.mrf.mxu3 }
0x1c87   :  { %v1489_v40 = vadd.f32 %v1488_v5, %v2179_v60 }
0x1c89   :  { %v1491_v42 = vmax.f32 %v1489_v40, 0.0 }
0x1c8b   :  { %1524 = vmatmul.f32.vlgmr.msra.gmra.mxu0 %v1491_v42 }
0x1d08   :  { %v1525_v30 = vpop.f32.mrf.mxu0 }
0x1d09   :  { %1529 = vrot.lane.b32.xlu2 %v1525_v30, %s1843_s2 }
0x1d63   :  { %v1530_v29 = vpop.permute.xlu2 %1529 }
0x1d64   :  { %v1532_v31 = vadd.f32 %v1530_v29, %v2323_v26 }
0x1d66   :  { %v1533_v16 = vadd.f32 %v1532_v31, %v2189_v44 }
0x1d68   :  { %v1535_v48 = vrot.slane %v1533_v16, 4  ;;  %1536 = vst [vmem:[#allocation1] ss:$2 sm:$0xff] %v1533_v16 }
0x1d6a   :  { %1539 = vst [vmem:[#allocation1 + $0x10] ss:$2 sm:$0xff] %v1535_v48 }
0x1d6f   :  { %v1537_v17 = vld.sshfl [vmem:[#allocation1] sm:$0xff pattern:$0x75316420] }
0x1d70   :  { %1541 = vrot.lane.b32.xlu2 %v1537_v17, %s1844_s3 }
0x1d71   :  { %v1540_v9 = vld.sshfl [vmem:[#allocation1 + $0x10] sm:$0xff pattern:$0x75316420] }
0x1d78   :  { %1543 = vrot.lane.b32.xlu2 %v1540_v9, %s1844_s3 }
0x1dca   :  { %v1542_v60 = vpop.permute.xlu2 %1541 }
0x1dcb   :  { %1548 = vst.msk [vmem:[#allocation10] sm:$0xf] %vm1547_vm0, %v1542_v60 }
0x1dd2   :  { %v1544_v44 = vpop.permute.xlu2 %1543 }
0x1dd3   :  { %1549 = vst.msk [vmem:[#allocation10 + $0x4] sm:$0xf] %vm1547_vm0, %v1544_v44 }
0x1dd4   :  { %1562 = dma.vmem_to_hbm [thread:$0]  %s1555_s12, 128, %s1557_s15, [#allocation4], %s1835_s23, %s1835_s23, %s1836_s24  }
0x1dd5   :  { %1832 = dma.done.wait [#allocation4], 128  }
0x1dd6   :  { %1833 = vsyncadd [#allocation4], 4294967168 }
0x1dd7   :  { %1567 = vsyncpa [#allocation3], 1 }
0x1dd8   :  { %1568 = vsyncpa [#allocation6], 1 }
0x1dd9   :  { %1569 = vsyncpa [#allocation9], 1 }
0x1dda   :  { %1570 = vsyncpa [#allocation4], 1 }

</bundles_post_ra>
